<compile_context>
chip_gen: v5e
topology: v5e:2x2
jax: 0.10.0
libtpu: 0.0.40
codegen_flags: <defaults>
</compile_context>

<pallas_src>
import functools

import jax
import jax.numpy as jnp
from jax import lax
from jax.experimental import pallas as pl
from jax.experimental.pallas import tpu as pltpu


def _round_up(x, m):
    return ((x + m - 1) // m) * m


def _pick_time_chunk(T, max_tc=16):
    """Largest divisor of T that is <= max_tc (keeps grid math exact)."""
    for tc in range(min(T, max_tc), 0, -1):
        if T % tc == 0:
            return tc
    return 1


# ----------------------------------------------------------------------------
# Kernel 1: fully-parallel tiled matmul + bias (used for the hoisted layer-0
# input projection and for the vocab output projection).
# ----------------------------------------------------------------------------
def _proj_kernel(a_ref, w_ref, b_ref, o_ref):
    o_ref[...] = (
        jnp.dot(a_ref[...], w_ref[...], preferred_element_type=jnp.float32)
        + b_ref[...]
    ).astype(o_ref.dtype)


def _matmul_bias(a, w, b, out_dtype):
    """(rows, K) @ (K, N) + (1, N).  K and N must already be 128-multiples."""
    rows, K = a.shape
    N = w.shape[1]
    tm = min(128, _round_up(rows, 16))
    rows_p = _round_up(rows, tm)
    if rows_p > rows:
        a = jnp.pad(a, ((0, rows_p - rows), (0, 0)))
    tn = 128
    out = pl.pallas_call(
        _proj_kernel,
        out_shape=jax.ShapeDtypeStruct((rows_p, N), out_dtype),
        grid_spec=pltpu.PrefetchScalarGridSpec(
            num_scalar_prefetch=0,
            grid=(rows_p // tm, N // tn),
            in_specs=[
                pl.BlockSpec((tm, K), lambda i, j: (i, 0)),
                pl.BlockSpec((K, tn), lambda i, j: (0, j)),
                pl.BlockSpec((1, tn), lambda i, j: (0, j)),
            ],
            out_specs=pl.BlockSpec((tm, tn), lambda i, j: (i, j)),
        ),
        compiler_params=pltpu.CompilerParams(
            dimension_semantics=("parallel", "parallel"),
            vmem_limit_bytes=64 * 1024 * 1024,
        ),
    )(a, w, b)
    return out[:rows]


# ----------------------------------------------------------------------------
# Kernel 2: sequential recurrence over time chunks.  Layer 0's input
# projection (+ bias) has been hoisted out; it arrives as `pre0`.
# ----------------------------------------------------------------------------
def _make_rnn_kernel(num_layers):
    # per layer 0: w_hh (bf16); per layer >0: w_ih (bf16), w_hh (bf16), bias (f32)
    nw = 1 + 3 * (num_layers - 1)

    def kernel(pre0_ref, h0_ref, *rest):
        w_refs = rest[:nw]
        top_ref = rest[nw]        # (Tc, Bb, H_pad) bf16   top-layer hidden out
        hT_ref = rest[nw + 1]     # (L,  Bb, H_pad) f32    final hidden out
        h_scr = rest[nw + 2]      # (L,  Bb, H_pad) f32    carried hidden state

        c = pl.program_id(1)      # time-chunk axis ("arbitrary" / sequential)

        @pl.when(c == 0)
        def _():
            h_scr[...] = h0_ref[...]

        tc = pre0_ref.shape[0]    # static chunk length

        def step(t, carry):
            # Layer 0: only the hidden-hidden matmul remains here.
            pre = pre0_ref[t] + jnp.dot(
                h_scr[0].astype(jnp.bfloat16), w_refs[0][...],
                preferred_element_type=jnp.float32)
            h_new = jnp.tanh(pre)                             # f32
            h_scr[0] = h_new
            inp = h_new.astype(jnp.bfloat16)
            for l in range(1, num_layers):
                w_ih = w_refs[1 + 3 * (l - 1)][...]           # bf16
                w_hh = w_refs[2 + 3 * (l - 1)][...]           # bf16
                bias = w_refs[3 + 3 * (l - 1)][...]           # (1, H_pad) f32
                h_prev = h_scr[l]                             # (Bb, H_pad) f32
                pre = (
                    jnp.dot(inp, w_ih, preferred_element_type=jnp.float32)
                    + jnp.dot(h_prev.astype(jnp.bfloat16), w_hh,
                              preferred_element_type=jnp.float32)
                    + bias
                )
                h_new = jnp.tanh(pre)
                h_scr[l] = h_new
                inp = h_new.astype(jnp.bfloat16)
            top_ref[t] = inp                                  # bf16 store
            return carry

        lax.fori_loop(0, tc, step, 0, unroll=True)

        # Only write the final hidden state back on the last time chunk.
        @pl.when(c == pl.num_programs(1) - 1)
        def _():
            hT_ref[...] = h_scr[...]

    return kernel


# ----------------------------------------------------------------------------
# Wrapper
# ----------------------------------------------------------------------------
@functools.partial(jax.jit, static_argnames=("num_layers",))
def rnn_lm_forward(tokens, h0, params, num_layers):
    """Forward pass: (logits (B, T, V), h_T (L, B, H))."""
    embed_tbl = params["embed"]                       # (V, E) f32
    B, T = tokens.shape
    L, _, H = h0.shape
    V, E = embed_tbl.shape

    B_pad = _round_up(B, 8)
    E_pad = _round_up(E, 128)
    H_pad = _round_up(H, 128)
    V_pad = _round_up(V, 128)

    # Megacore: split padded batch across a parallel grid axis when large
    # enough to keep bf16 sublane tiling aligned; trivially 1 for small demos.
    nb = 2 if B_pad % 32 == 0 else 1
    Bb = B_pad // nb

    Tc = _pick_time_chunk(T)
    n_chunks = T // Tc

    # ---- glue: embedding gather, time-major layout, padding, bf16 cast ----
    x_emb = jnp.take(embed_tbl, tokens, axis=0)               # (B, T, E)
    x_tme = jnp.transpose(x_emb, (1, 0, 2))                   # (T, B, E)
    x_tme = jnp.pad(x_tme, ((0, 0), (0, B_pad - B), (0, E_pad - E)))
    x_tme = x_tme.astype(jnp.bfloat16)

    h0_p = jnp.pad(h0, ((0, 0), (0, B_pad - B), (0, H_pad - H))).astype(jnp.float32)

    # ---- hoisted layer-0 input projection: (T*B, E) @ (E, H) + b0 ----
    w_ih0 = jnp.pad(params["w_ih_0"],
                    ((0, E_pad - E), (0, H_pad - H))).astype(jnp.bfloat16)
    bias0 = jnp.pad(params["b_ih_0"] + params["b_hh_0"],
                    ((0, 0), (0, H_pad - H))).astype(jnp.float32)
    pre0 = _matmul_bias(x_tme.reshape(T * B_pad, E_pad), w_ih0, bias0,
                        jnp.float32).reshape(T, B_pad, H_pad)

    # Remaining recurrence weights: pre-transposed (in, H), padded, bf16.
    w_args = [jnp.pad(params["w_hh_0"],
                      ((0, H_pad - H), (0, H_pad - H))).astype(jnp.bfloat16)]
    for l in range(1, num_layers):
        w_ih = jnp.pad(params[f"w_ih_{l}"], ((0, H_pad - H), (0, H_pad - H)))
        w_hh = jnp.pad(params[f"w_hh_{l}"], ((0, H_pad - H), (0, H_pad - H)))
        bias = jnp.pad(params[f"b_ih_{l}"] + params[f"b_hh_{l}"],
                       ((0, 0), (0, H_pad - H)))
        w_args += [w_ih.astype(jnp.bfloat16), w_hh.astype(jnp.bfloat16),
                   bias.astype(jnp.float32)]

    def full_spec(arr):
        zeros = (0,) * arr.ndim
        return pl.BlockSpec(arr.shape, lambda b_, c_: zeros)

    in_specs = [
        pl.BlockSpec((Tc, Bb, H_pad), lambda b_, c_: (c_, b_, 0)),   # pre0 chunk
        pl.BlockSpec((L, Bb, H_pad), lambda b_, c_: (0, b_, 0)),     # h0
    ] + [full_spec(a) for a in w_args]

    out_specs = [
        pl.BlockSpec((Tc, Bb, H_pad), lambda b_, c_: (c_, b_, 0)),   # top hidden
        pl.BlockSpec((L, Bb, H_pad), lambda b_, c_: (0, b_, 0)),     # final hidden
    ]

    out_shape = [
        jax.ShapeDtypeStruct((T, B_pad, H_pad), jnp.bfloat16),
        jax.ShapeDtypeStruct((L, B_pad, H_pad), jnp.float32),
    ]

    top_h, h_T_p = pl.pallas_call(
        _make_rnn_kernel(num_layers),
        out_shape=out_shape,
        grid_spec=pltpu.PrefetchScalarGridSpec(
            num_scalar_prefetch=0,
            grid=(nb, n_chunks),
            in_specs=in_specs,
            out_specs=out_specs,
            scratch_shapes=[pltpu.VMEM((L, Bb, H_pad), jnp.float32)],
        ),
        compiler_params=pltpu.CompilerParams(
            dimension_semantics=("parallel", "arbitrary"),
            vmem_limit_bytes=64 * 1024 * 1024,
        ),
    )(pre0, h0_p, *w_args)

    # ---- hoisted output projection: (B*T, H) @ (H, V) + b_out ----
    # Transpose the SMALL (.., H) tensor to batch-major so the big (.., V)
    # logits come out already in (B, T, V) order (no large transpose).
    w_out_p = jnp.pad(params["w_out"],
                      ((0, H_pad - H), (0, V_pad - V))).astype(jnp.bfloat16)
    b_out_p = jnp.pad(params["b_out"], ((0, 0), (0, V_pad - V))).astype(jnp.float32)

    top_bt = jnp.transpose(top_h, (1, 0, 2)).reshape(B_pad * T, H_pad)  # bf16
    # TODO(synk): emit bf16 logits (or fuse downstream softmax/loss) to halve
    # the dominant HBM write; kept f32 here for tight validation.
    logits_rows = _matmul_bias(top_bt, w_out_p, b_out_p, jnp.float32)

    logits = logits_rows.reshape(B_pad, T, V_pad)[:B, :, :V]  # (B, T, V)
    h_T = h_T_p[:, :B, :H]
    return logits, h_T


# ----------------------------------------------------------------------------
# Parameters & reference
# ----------------------------------------------------------------------------
def init_params(key, vocab_size, embed_size, hidden_size, num_layers):
    """Deterministic parameter init (orthogonal RNN weights like use_ortho=True)."""
    params = {}
    keys = jax.random.split(key, 4 * num_layers + 4)
    ki = iter(range(len(keys)))

    params["embed"] = jax.random.normal(
        keys[next(ki)], (vocab_size, embed_size), jnp.float32)

    def orth(k, rows, cols):
        a = jax.random.normal(k, (max(rows, cols), min(rows, cols)), jnp.float32)
        q, _ = jnp.linalg.qr(a)
        q = q[:rows, :cols] if rows >= cols else q[:cols, :rows].T
        return q

    scale = 1.0 / jnp.sqrt(hidden_size)
    for l in range(num_layers):
        in_l = embed_size if l == 0 else hidden_size
        # PyTorch stores weight_ih (H, in); kernel wants (in, H) for x @ W.
        params[f"w_ih_{l}"] = orth(keys[next(ki)], hidden_size, in_l).T
        params[f"w_hh_{l}"] = orth(keys[next(ki)], hidden_size, hidden_size).T
        params[f"b_ih_{l}"] = jax.random.uniform(
            keys[next(ki)], (1, hidden_size), jnp.float32, -scale, scale)
        params[f"b_hh_{l}"] = jax.random.uniform(
            keys[next(ki)], (1, hidden_size), jnp.float32, -scale, scale)

    params["w_out"] = jax.random.uniform(
        keys[next(ki)], (hidden_size, vocab_size), jnp.float32, -scale, scale)
    params["b_out"] = jax.random.uniform(
        keys[next(ki)], (1, vocab_size), jnp.float32, -scale, scale)
    return params


def reference_forward(tokens, h0, params, num_layers):
    """Pure-JAX reference mirroring the kernel's bf16-matmul / f32-accum math."""
    def mm(a, w):
        return jnp.dot(a.astype(jnp.bfloat16), w.astype(jnp.bfloat16),
                       preferred_element_type=jnp.float32)

    x = jnp.take(params["embed"], tokens, axis=0)            # (B, T, E)
    B, T, _ = x.shape
    h = h0
    outs = []
    for t in range(T):
        inp = x[:, t, :]
        new_h = []
        for l in range(num_layers):
            bias = params[f"b_ih_{l}"] + params[f"b_hh_{l}"]
            hl = jnp.tanh(mm(inp, params[f"w_ih_{l}"])
                          + mm(h[l], params[f"w_hh_{l}"]) + bias)
            new_h.append(hl)
            inp = hl
        h = jnp.stack(new_h, axis=0)
        outs.append(inp)
    top = jnp.stack(outs, axis=1)                            # (B, T, H)
    logits = mm(top, params["w_out"]) + params["b_out"]      # (B, T, V)
    return logits, h


if __name__ == "__main__":
    vocab_size, embed_size, hidden_size, num_layers = 32, 16, 32, 2
    batch, seq = 2, 8

    key = jax.random.PRNGKey(0)
    k_param, k_tok = jax.random.split(key)

    params = init_params(k_param, vocab_size, embed_size, hidden_size, num_layers)
    tokens = jax.random.randint(k_tok, (batch, seq), 0, vocab_size, dtype=jnp.int32)
    h0 = jnp.zeros((num_layers, batch, hidden_size), jnp.float32)  # init_hidden

    logits, h_T = rnn_lm_forward(tokens, h0, params, num_layers)
    jax.block_until_ready((logits, h_T))

    ref_logits, ref_h = reference_forward(tokens, h0, params, num_layers)
    assert logits.shape == (batch, seq, vocab_size)
    assert h_T.shape == (num_layers, batch, hidden_size)
    assert jnp.allclose(logits, ref_logits, rtol=1e-2, atol=1e-2), \
        float(jnp.max(jnp.abs(logits - ref_logits)))
    assert jnp.allclose(h_T, ref_h, rtol=1e-2, atol=1e-2), \
        float(jnp.max(jnp.abs(h_T - ref_h)))

    print("KERNEL_OK")
</pallas_src>

<mosaic_0001>
module attributes {stable_mosaic.version = 11 : i64} {
  func.func @_proj_kernel(%arg0: i32, %arg1: i32, %arg2: memref<64x128xbf16, #tpu.memory_space<vmem>>, %arg3: memref<128x128xbf16, #tpu.memory_space<vmem>>, %arg4: memref<1x128xf32, #tpu.memory_space<vmem>>, %arg5: memref<64x128xf32, #tpu.memory_space<vmem>>) attributes {dimension_semantics = [#tpu.dimension_semantics<parallel>, #tpu.dimension_semantics<parallel>], iteration_bounds = array<i64: 1, 1>, scalar_prefetch = 0 : i64, scratch_operands = 0 : i64, tpu.core_type = #tpu.core_type<tc>, window_params = [{transform_indices = @transform_0, window_bounds = array<i64: 64, 128>}, {transform_indices = @transform_1, window_bounds = array<i64: 128, 128>}, {transform_indices = @transform_2, window_bounds = array<i64: 1, 128>}, {transform_indices = @transform_3, window_bounds = array<i64: 64, 128>}]} {
    %c0 = arith.constant 0 : index
    %c0_0 = arith.constant 0 : index
    %0 = vector.load %arg2[%c0, %c0_0] : memref<64x128xbf16, #tpu.memory_space<vmem>>, vector<64x128xbf16>
    %c0_1 = arith.constant 0 : index
    %c0_2 = arith.constant 0 : index
    %1 = vector.load %arg3[%c0_1, %c0_2] : memref<128x128xbf16, #tpu.memory_space<vmem>>, vector<128x128xbf16>
    %cst = arith.constant dense<0.000000e+00> : vector<64x128xf32>
    %2 = tpu.matmul %0, %1, %cst {dimension_numbers = #tpu.dot_dimension_numbers<[1], [0], [0], [1], [0, 0, 1, 1], [], []>} : vector<64x128xbf16>, vector<128x128xbf16>, vector<64x128xf32> -> vector<64x128xf32>
    %c0_3 = arith.constant 0 : index
    %c0_4 = arith.constant 0 : index
    %3 = vector.load %arg4[%c0_3, %c0_4] : memref<1x128xf32, #tpu.memory_space<vmem>>, vector<1x128xf32>
    %4 = vector.broadcast %3 : vector<1x128xf32> to vector<64x128xf32>
    %5 = arith.addf %2, %4 : vector<64x128xf32>
    %c0_5 = arith.constant 0 : index
    %c0_6 = arith.constant 0 : index
    %6 = vector.load %arg5[%c0_5, %c0_6] : memref<64x128xf32, #tpu.memory_space<vmem>>, vector<64x128xf32>
    tpu.vector_store %arg5[%c0_5, %c0_6], %5 {strides = array<i32>} : memref<64x128xf32, #tpu.memory_space<vmem>>, vector<64x128xf32>,
    return
  }
  func.func @transform_0(%arg0: i32, %arg1: i32) -> (i32, i32) {
    %c0_i32 = arith.constant 0 : i32
    %c0_i32_0 = arith.constant 0 : i32
    return %arg0, %c0_i32 : i32, i32
  }
  func.func @transform_1(%arg0: i32, %arg1: i32) -> (i32, i32) {
    %c0_i32 = arith.constant 0 : i32
    %c0_i32_0 = arith.constant 0 : i32
    return %c0_i32, %arg1 : i32, i32
  }
  func.func @transform_2(%arg0: i32, %arg1: i32) -> (i32, i32) {
    %c0_i32 = arith.constant 0 : i32
    %c0_i32_0 = arith.constant 0 : i32
    return %c0_i32, %arg1 : i32, i32
  }
  func.func @transform_3(%arg0: i32, %arg1: i32) -> (i32, i32) {
    %c0_i32 = arith.constant 0 : i32
    return %arg0, %arg1 : i32, i32
  }
}

module attributes {stable_mosaic.version = 11 : i64} {
  func.func @kernel(%arg0: i32, %arg1: i32, %arg2: memref<8x8x128xf32, #tpu.memory_space<vmem>>, %arg3: memref<2x8x128xf32, #tpu.memory_space<vmem>>, %arg4: memref<128x128xbf16, #tpu.memory_space<vmem>>, %arg5: memref<128x128xbf16, #tpu.memory_space<vmem>>, %arg6: memref<128x128xbf16, #tpu.memory_space<vmem>>, %arg7: memref<1x128xf32, #tpu.memory_space<vmem>>, %arg8: memref<8x8x128xbf16, #tpu.memory_space<vmem>>, %arg9: memref<2x8x128xf32, #tpu.memory_space<vmem>>, %arg10: memref<2x8x128xf32, #tpu.memory_space<vmem>>) attributes {dimension_semantics = [#tpu.dimension_semantics<parallel>, #tpu.dimension_semantics<arbitrary>], iteration_bounds = array<i64: 1, 1>, scalar_prefetch = 0 : i64, scratch_operands = 1 : i64, tpu.core_type = #tpu.core_type<tc>, window_params = [{transform_indices = @transform_0, window_bounds = array<i64: 8, 8, 128>}, {transform_indices = @transform_1, window_bounds = array<i64: 2, 8, 128>}, {pipeline_mode = #tpu.pipeline_mode<synchronous>, transform_indices = @transform_2, window_bounds = array<i64: 128, 128>}, {pipeline_mode = #tpu.pipeline_mode<synchronous>, transform_indices = @transform_3, window_bounds = array<i64: 128, 128>}, {pipeline_mode = #tpu.pipeline_mode<synchronous>, transform_indices = @transform_4, window_bounds = array<i64: 128, 128>}, {pipeline_mode = #tpu.pipeline_mode<synchronous>, transform_indices = @transform_5, window_bounds = array<i64: 1, 128>}, {transform_indices = @transform_6, window_bounds = array<i64: 8, 8, 128>}, {transform_indices = @transform_7, window_bounds = array<i64: 2, 8, 128>}]} {
    %c0_i32 = arith.constant 0 : i32
    %0 = arith.cmpi eq, %arg1, %c0_i32 : i32
    %1 = arith.extui %0 : i1 to i32
    %c0_i32_0 = arith.constant 0 : i32
    %2 = arith.cmpi ne, %1, %c0_i32_0 : i32
    scf.if %2 {
      %c0_217 = arith.constant 0 : index
      %c0_218 = arith.constant 0 : index
      %c0_219 = arith.constant 0 : index
      %278 = vector.load %arg3[%c0_217, %c0_218, %c0_219] : memref<2x8x128xf32, #tpu.memory_space<vmem>>, vector<2x8x128xf32>
      %c0_220 = arith.constant 0 : index
      %c0_221 = arith.constant 0 : index
      %c0_222 = arith.constant 0 : index
      %279 = vector.load %arg10[%c0_220, %c0_221, %c0_222] : memref<2x8x128xf32, #tpu.memory_space<vmem>>, vector<2x8x128xf32>
      tpu.vector_store %arg10[%c0_220, %c0_221, %c0_222], %278 {strides = array<i32>} : memref<2x8x128xf32, #tpu.memory_space<vmem>>, vector<2x8x128xf32>,
    } else {
    }
    %c0_i32_1 = arith.constant 0 : i32
    %3 = arith.index_cast %c0_i32_1 : i32 to index
    %c0 = arith.constant 0 : index
    %c0_2 = arith.constant 0 : index
    %4 = vector.load %arg2[%3, %c0, %c0_2] : memref<8x8x128xf32, #tpu.memory_space<vmem>>, vector<1x8x128xf32>
    %5 = vector.shape_cast %4 : vector<1x8x128xf32> to vector<8x128xf32>
    %c0_3 = arith.constant 0 : index
    %c0_4 = arith.constant 0 : index
    %c0_5 = arith.constant 0 : index
    %6 = vector.load %arg10[%c0_3, %c0_4, %c0_5] : memref<2x8x128xf32, #tpu.memory_space<vmem>>, vector<1x8x128xf32>
    %7 = vector.shape_cast %6 : vector<1x8x128xf32> to vector<8x128xf32>
    %8 = arith.truncf %7 : vector<8x128xf32> to vector<8x128xbf16>
    %c0_6 = arith.constant 0 : index
    %c0_7 = arith.constant 0 : index
    %9 = vector.load %arg4[%c0_6, %c0_7] : memref<128x128xbf16, #tpu.memory_space<vmem>>, vector<128x128xbf16>
    %cst = arith.constant dense<0.000000e+00> : vector<8x128xf32>
    %10 = tpu.matmul %8, %9, %cst {dimension_numbers = #tpu.dot_dimension_numbers<[1], [0], [0], [1], [0, 0, 1, 1], [], []>} : vector<8x128xbf16>, vector<128x128xbf16>, vector<8x128xf32> -> vector<8x128xf32>
    %11 = arith.addf %5, %10 : vector<8x128xf32>
    %12 = math.tanh %11 : vector<8x128xf32>
    %c0_8 = arith.constant 0 : index
    %c0_9 = arith.constant 0 : index
    %c0_10 = arith.constant 0 : index
    %13 = vector.load %arg10[%c0_8, %c0_9, %c0_10] : memref<2x8x128xf32, #tpu.memory_space<vmem>>, vector<1x8x128xf32>
    %14 = vector.shape_cast %13 : vector<1x8x128xf32> to vector<8x128xf32>
    %15 = vector.shape_cast %12 : vector<8x128xf32> to vector<1x8x128xf32>
    tpu.vector_store %arg10[%c0_8, %c0_9, %c0_10], %15 {strides = array<i32>} : memref<2x8x128xf32, #tpu.memory_space<vmem>>, vector<1x8x128xf32>,
    %16 = arith.truncf %12 : vector<8x128xf32> to vector<8x128xbf16>
    %c0_11 = arith.constant 0 : index
    %c0_12 = arith.constant 0 : index
    %17 = vector.load %arg5[%c0_11, %c0_12] : memref<128x128xbf16, #tpu.memory_space<vmem>>, vector<128x128xbf16>
    %c0_13 = arith.constant 0 : index
    %c0_14 = arith.constant 0 : index
    %18 = vector.load %arg6[%c0_13, %c0_14] : memref<128x128xbf16, #tpu.memory_space<vmem>>, vector<128x128xbf16>
    %c0_15 = arith.constant 0 : index
    %c0_16 = arith.constant 0 : index
    %19 = vector.load %arg7[%c0_15, %c0_16] : memref<1x128xf32, #tpu.memory_space<vmem>>, vector<1x128xf32>
    %c1 = arith.constant 1 : index
    %c0_17 = arith.constant 0 : index
    %c0_18 = arith.constant 0 : index
    %20 = vector.load %arg10[%c1, %c0_17, %c0_18] : memref<2x8x128xf32, #tpu.memory_space<vmem>>, vector<1x8x128xf32>
    %21 = vector.shape_cast %20 : vector<1x8x128xf32> to vector<8x128xf32>
    %cst_19 = arith.constant dense<0.000000e+00> : vector<8x128xf32>
    %22 = tpu.matmul %16, %17, %cst_19 {dimension_numbers = #tpu.dot_dimension_numbers<[1], [0], [0], [1], [0, 0, 1, 1], [], []>} : vector<8x128xbf16>, vector<128x128xbf16>, vector<8x128xf32> -> vector<8x128xf32>
    %23 = arith.truncf %21 : vector<8x128xf32> to vector<8x128xbf16>
    %cst_20 = arith.constant dense<0.000000e+00> : vector<8x128xf32>
    %24 = tpu.matmul %23, %18, %cst_20 {dimension_numbers = #tpu.dot_dimension_numbers<[1], [0], [0], [1], [0, 0, 1, 1], [], []>} : vector<8x128xbf16>, vector<128x128xbf16>, vector<8x128xf32> -> vector<8x128xf32>
    %25 = arith.addf %22, %24 : vector<8x128xf32>
    %26 = vector.broadcast %19 : vector<1x128xf32> to vector<8x128xf32>
    %27 = arith.addf %25, %26 : vector<8x128xf32>
    %28 = math.tanh %27 : vector<8x128xf32>
    %c1_21 = arith.constant 1 : index
    %c0_22 = arith.constant 0 : index
    %c0_23 = arith.constant 0 : index
    %29 = vector.load %arg10[%c1_21, %c0_22, %c0_23] : memref<2x8x128xf32, #tpu.memory_space<vmem>>, vector<1x8x128xf32>
    %30 = vector.shape_cast %29 : vector<1x8x128xf32> to vector<8x128xf32>
    %31 = vector.shape_cast %28 : vector<8x128xf32> to vector<1x8x128xf32>
    tpu.vector_store %arg10[%c1_21, %c0_22, %c0_23], %31 {strides = array<i32>} : memref<2x8x128xf32, #tpu.memory_space<vmem>>, vector<1x8x128xf32>,
    %32 = arith.truncf %28 : vector<8x128xf32> to vector<8x128xbf16>
    %33 = arith.index_cast %c0_i32_1 : i32 to index
    %c0_24 = arith.constant 0 : index
    %c0_25 = arith.constant 0 : index
    %34 = vector.load %arg8[%33, %c0_24, %c0_25] : memref<8x8x128xbf16, #tpu.memory_space<vmem>>, vector<1x8x128xbf16>
    %35 = vector.shape_cast %34 : vector<1x8x128xbf16> to vector<8x128xbf16>
    %36 = vector.shape_cast %32 : vector<8x128xbf16> to vector<1x8x128xbf16>
    tpu.vector_store %arg8[%33, %c0_24, %c0_25], %36 {strides = array<i32>} : memref<8x8x128xbf16, #tpu.memory_space<vmem>>, vector<1x8x128xbf16>,
    %c1_i32 = arith.constant 1 : i32
    %37 = arith.index_cast %c1_i32 : i32 to index
    %c0_26 = arith.constant 0 : index
    %c0_27 = arith.constant 0 : index
    %38 = vector.load %arg2[%37, %c0_26, %c0_27] : memref<8x8x128xf32, #tpu.memory_space<vmem>>, vector<1x8x128xf32>
    %39 = vector.shape_cast %38 : vector<1x8x128xf32> to vector<8x128xf32>
    %c0_28 = arith.constant 0 : index
    %c0_29 = arith.constant 0 : index
    %c0_30 = arith.constant 0 : index
    %40 = vector.load %arg10[%c0_28, %c0_29, %c0_30] : memref<2x8x128xf32, #tpu.memory_space<vmem>>, vector<1x8x128xf32>
    %41 = vector.shape_cast %40 : vector<1x8x128xf32> to vector<8x128xf32>
    %42 = arith.truncf %41 : vector<8x128xf32> to vector<8x128xbf16>
    %c0_31 = arith.constant 0 : index
    %c0_32 = arith.constant 0 : index
    %43 = vector.load %arg4[%c0_31, %c0_32] : memref<128x128xbf16, #tpu.memory_space<vmem>>, vector<128x128xbf16>
    %cst_33 = arith.constant dense<0.000000e+00> : vector<8x128xf32>
    %44 = tpu.matmul %42, %43, %cst_33 {dimension_numbers = #tpu.dot_dimension_numbers<[1], [0], [0], [1], [0, 0, 1, 1], [], []>} : vector<8x128xbf16>, vector<128x128xbf16>, vector<8x128xf32> -> vector<8x128xf32>
    %45 = arith.addf %39, %44 : vector<8x128xf32>
    %46 = math.tanh %45 : vector<8x128xf32>
    %c0_34 = arith.constant 0 : index
    %c0_35 = arith.constant 0 : index
    %c0_36 = arith.constant 0 : index
    %47 = vector.load %arg10[%c0_34, %c0_35, %c0_36] : memref<2x8x128xf32, #tpu.memory_space<vmem>>, vector<1x8x128xf32>
    %48 = vector.shape_cast %47 : vector<1x8x128xf32> to vector<8x128xf32>
    %49 = vector.shape_cast %46 : vector<8x128xf32> to vector<1x8x128xf32>
    tpu.vector_store %arg10[%c0_34, %c0_35, %c0_36], %49 {strides = array<i32>} : memref<2x8x128xf32, #tpu.memory_space<vmem>>, vector<1x8x128xf32>,
    %50 = arith.truncf %46 : vector<8x128xf32> to vector<8x128xbf16>
    %c0_37 = arith.constant 0 : index
    %c0_38 = arith.constant 0 : index
    %51 = vector.load %arg5[%c0_37, %c0_38] : memref<128x128xbf16, #tpu.memory_space<vmem>>, vector<128x128xbf16>
    %c0_39 = arith.constant 0 : index
    %c0_40 = arith.constant 0 : index
    %52 = vector.load %arg6[%c0_39, %c0_40] : memref<128x128xbf16, #tpu.memory_space<vmem>>, vector<128x128xbf16>
    %c0_41 = arith.constant 0 : index
    %c0_42 = arith.constant 0 : index
    %53 = vector.load %arg7[%c0_41, %c0_42] : memref<1x128xf32, #tpu.memory_space<vmem>>, vector<1x128xf32>
    %c1_43 = arith.constant 1 : index
    %c0_44 = arith.constant 0 : index
    %c0_45 = arith.constant 0 : index
    %54 = vector.load %arg10[%c1_43, %c0_44, %c0_45] : memref<2x8x128xf32, #tpu.memory_space<vmem>>, vector<1x8x128xf32>
    %55 = vector.shape_cast %54 : vector<1x8x128xf32> to vector<8x128xf32>
    %cst_46 = arith.constant dense<0.000000e+00> : vector<8x128xf32>
    %56 = tpu.matmul %50, %51, %cst_46 {dimension_numbers = #tpu.dot_dimension_numbers<[1], [0], [0], [1], [0, 0, 1, 1], [], []>} : vector<8x128xbf16>, vector<128x128xbf16>, vector<8x128xf32> -> vector<8x128xf32>
    %57 = arith.truncf %55 : vector<8x128xf32> to vector<8x128xbf16>
    %cst_47 = arith.constant dense<0.000000e+00> : vector<8x128xf32>
    %58 = tpu.matmul %57, %52, %cst_47 {dimension_numbers = #tpu.dot_dimension_numbers<[1], [0], [0], [1], [0, 0, 1, 1], [], []>} : vector<8x128xbf16>, vector<128x128xbf16>, vector<8x128xf32> -> vector<8x128xf32>
    %59 = arith.addf %56, %58 : vector<8x128xf32>
    %60 = vector.broadcast %53 : vector<1x128xf32> to vector<8x128xf32>
    %61 = arith.addf %59, %60 : vector<8x128xf32>
    %62 = math.tanh %61 : vector<8x128xf32>
    %c1_48 = arith.constant 1 : index
    %c0_49 = arith.constant 0 : index
    %c0_50 = arith.constant 0 : index
    %63 = vector.load %arg10[%c1_48, %c0_49, %c0_50] : memref<2x8x128xf32, #tpu.memory_space<vmem>>, vector<1x8x128xf32>
    %64 = vector.shape_cast %63 : vector<1x8x128xf32> to vector<8x128xf32>
    %65 = vector.shape_cast %62 : vector<8x128xf32> to vector<1x8x128xf32>
    tpu.vector_store %arg10[%c1_48, %c0_49, %c0_50], %65 {strides = array<i32>} : memref<2x8x128xf32, #tpu.memory_space<vmem>>, vector<1x8x128xf32>,
    %66 = arith.truncf %62 : vector<8x128xf32> to vector<8x128xbf16>
    %67 = arith.index_cast %c1_i32 : i32 to index
    %c0_51 = arith.constant 0 : index
    %c0_52 = arith.constant 0 : index
    %68 = vector.load %arg8[%67, %c0_51, %c0_52] : memref<8x8x128xbf16, #tpu.memory_space<vmem>>, vector<1x8x128xbf16>
    %69 = vector.shape_cast %68 : vector<1x8x128xbf16> to vector<8x128xbf16>
    %70 = vector.shape_cast %66 : vector<8x128xbf16> to vector<1x8x128xbf16>
    tpu.vector_store %arg8[%67, %c0_51, %c0_52], %70 {strides = array<i32>} : memref<8x8x128xbf16, #tpu.memory_space<vmem>>, vector<1x8x128xbf16>,
    %c2_i32 = arith.constant 2 : i32
    %71 = arith.index_cast %c2_i32 : i32 to index
    %c0_53 = arith.constant 0 : index
    %c0_54 = arith.constant 0 : index
    %72 = vector.load %arg2[%71, %c0_53, %c0_54] : memref<8x8x128xf32, #tpu.memory_space<vmem>>, vector<1x8x128xf32>
    %73 = vector.shape_cast %72 : vector<1x8x128xf32> to vector<8x128xf32>
    %c0_55 = arith.constant 0 : index
    %c0_56 = arith.constant 0 : index
    %c0_57 = arith.constant 0 : index
    %74 = vector.load %arg10[%c0_55, %c0_56, %c0_57] : memref<2x8x128xf32, #tpu.memory_space<vmem>>, vector<1x8x128xf32>
    %75 = vector.shape_cast %74 : vector<1x8x128xf32> to vector<8x128xf32>
    %76 = arith.truncf %75 : vector<8x128xf32> to vector<8x128xbf16>
    %c0_58 = arith.constant 0 : index
    %c0_59 = arith.constant 0 : index
    %77 = vector.load %arg4[%c0_58, %c0_59] : memref<128x128xbf16, #tpu.memory_space<vmem>>, vector<128x128xbf16>
    %cst_60 = arith.constant dense<0.000000e+00> : vector<8x128xf32>
    %78 = tpu.matmul %76, %77, %cst_60 {dimension_numbers = #tpu.dot_dimension_numbers<[1], [0], [0], [1], [0, 0, 1, 1], [], []>} : vector<8x128xbf16>, vector<128x128xbf16>, vector<8x128xf32> -> vector<8x128xf32>
    %79 = arith.addf %73, %78 : vector<8x128xf32>
    %80 = math.tanh %79 : vector<8x128xf32>
    %c0_61 = arith.constant 0 : index
    %c0_62 = arith.constant 0 : index
    %c0_63 = arith.constant 0 : index
    %81 = vector.load %arg10[%c0_61, %c0_62, %c0_63] : memref<2x8x128xf32, #tpu.memory_space<vmem>>, vector<1x8x128xf32>
    %82 = vector.shape_cast %81 : vector<1x8x128xf32> to vector<8x128xf32>
    %83 = vector.shape_cast %80 : vector<8x128xf32> to vector<1x8x128xf32>
    tpu.vector_store %arg10[%c0_61, %c0_62, %c0_63], %83 {strides = array<i32>} : memref<2x8x128xf32, #tpu.memory_space<vmem>>, vector<1x8x128xf32>,
    %84 = arith.truncf %80 : vector<8x128xf32> to vector<8x128xbf16>
    %c0_64 = arith.constant 0 : index
    %c0_65 = arith.constant 0 : index
    %85 = vector.load %arg5[%c0_64, %c0_65] : memref<128x128xbf16, #tpu.memory_space<vmem>>, vector<128x128xbf16>
    %c0_66 = arith.constant 0 : index
    %c0_67 = arith.constant 0 : index
    %86 = vector.load %arg6[%c0_66, %c0_67] : memref<128x128xbf16, #tpu.memory_space<vmem>>, vector<128x128xbf16>
    %c0_68 = arith.constant 0 : index
    %c0_69 = arith.constant 0 : index
    %87 = vector.load %arg7[%c0_68, %c0_69] : memref<1x128xf32, #tpu.memory_space<vmem>>, vector<1x128xf32>
    %c1_70 = arith.constant 1 : index
    %c0_71 = arith.constant 0 : index
    %c0_72 = arith.constant 0 : index
    %88 = vector.load %arg10[%c1_70, %c0_71, %c0_72] : memref<2x8x128xf32, #tpu.memory_space<vmem>>, vector<1x8x128xf32>
    %89 = vector.shape_cast %88 : vector<1x8x128xf32> to vector<8x128xf32>
    %cst_73 = arith.constant dense<0.000000e+00> : vector<8x128xf32>
    %90 = tpu.matmul %84, %85, %cst_73 {dimension_numbers = #tpu.dot_dimension_numbers<[1], [0], [0], [1], [0, 0, 1, 1], [], []>} : vector<8x128xbf16>, vector<128x128xbf16>, vector<8x128xf32> -> vector<8x128xf32>
    %91 = arith.truncf %89 : vector<8x128xf32> to vector<8x128xbf16>
    %cst_74 = arith.constant dense<0.000000e+00> : vector<8x128xf32>
    %92 = tpu.matmul %91, %86, %cst_74 {dimension_numbers = #tpu.dot_dimension_numbers<[1], [0], [0], [1], [0, 0, 1, 1], [], []>} : vector<8x128xbf16>, vector<128x128xbf16>, vector<8x128xf32> -> vector<8x128xf32>
    %93 = arith.addf %90, %92 : vector<8x128xf32>
    %94 = vector.broadcast %87 : vector<1x128xf32> to vector<8x128xf32>
    %95 = arith.addf %93, %94 : vector<8x128xf32>
    %96 = math.tanh %95 : vector<8x128xf32>
    %c1_75 = arith.constant 1 : index
    %c0_76 = arith.constant 0 : index
    %c0_77 = arith.constant 0 : index
    %97 = vector.load %arg10[%c1_75, %c0_76, %c0_77] : memref<2x8x128xf32, #tpu.memory_space<vmem>>, vector<1x8x128xf32>
    %98 = vector.shape_cast %97 : vector<1x8x128xf32> to vector<8x128xf32>
    %99 = vector.shape_cast %96 : vector<8x128xf32> to vector<1x8x128xf32>
    tpu.vector_store %arg10[%c1_75, %c0_76, %c0_77], %99 {strides = array<i32>} : memref<2x8x128xf32, #tpu.memory_space<vmem>>, vector<1x8x128xf32>,
    %100 = arith.truncf %96 : vector<8x128xf32> to vector<8x128xbf16>
    %101 = arith.index_cast %c2_i32 : i32 to index
    %c0_78 = arith.constant 0 : index
    %c0_79 = arith.constant 0 : index
    %102 = vector.load %arg8[%101, %c0_78, %c0_79] : memref<8x8x128xbf16, #tpu.memory_space<vmem>>, vector<1x8x128xbf16>
    %103 = vector.shape_cast %102 : vector<1x8x128xbf16> to vector<8x128xbf16>
    %104 = vector.shape_cast %100 : vector<8x128xbf16> to vector<1x8x128xbf16>
    tpu.vector_store %arg8[%101, %c0_78, %c0_79], %104 {strides = array<i32>} : memref<8x8x128xbf16, #tpu.memory_space<vmem>>, vector<1x8x128xbf16>,
    %c3_i32 = arith.constant 3 : i32
    %105 = arith.index_cast %c3_i32 : i32 to index
    %c0_80 = arith.constant 0 : index
    %c0_81 = arith.constant 0 : index
    %106 = vector.load %arg2[%105, %c0_80, %c0_81] : memref<8x8x128xf32, #tpu.memory_space<vmem>>, vector<1x8x128xf32>
    %107 = vector.shape_cast %106 : vector<1x8x128xf32> to vector<8x128xf32>
    %c0_82 = arith.constant 0 : index
    %c0_83 = arith.constant 0 : index
    %c0_84 = arith.constant 0 : index
    %108 = vector.load %arg10[%c0_82, %c0_83, %c0_84] : memref<2x8x128xf32, #tpu.memory_space<vmem>>, vector<1x8x128xf32>
    %109 = vector.shape_cast %108 : vector<1x8x128xf32> to vector<8x128xf32>
    %110 = arith.truncf %109 : vector<8x128xf32> to vector<8x128xbf16>
    %c0_85 = arith.constant 0 : index
    %c0_86 = arith.constant 0 : index
    %111 = vector.load %arg4[%c0_85, %c0_86] : memref<128x128xbf16, #tpu.memory_space<vmem>>, vector<128x128xbf16>
    %cst_87 = arith.constant dense<0.000000e+00> : vector<8x128xf32>
    %112 = tpu.matmul %110, %111, %cst_87 {dimension_numbers = #tpu.dot_dimension_numbers<[1], [0], [0], [1], [0, 0, 1, 1], [], []>} : vector<8x128xbf16>, vector<128x128xbf16>, vector<8x128xf32> -> vector<8x128xf32>
    %113 = arith.addf %107, %112 : vector<8x128xf32>
    %114 = math.tanh %113 : vector<8x128xf32>
    %c0_88 = arith.constant 0 : index
    %c0_89 = arith.constant 0 : index
    %c0_90 = arith.constant 0 : index
    %115 = vector.load %arg10[%c0_88, %c0_89, %c0_90] : memref<2x8x128xf32, #tpu.memory_space<vmem>>, vector<1x8x128xf32>
    %116 = vector.shape_cast %115 : vector<1x8x128xf32> to vector<8x128xf32>
    %117 = vector.shape_cast %114 : vector<8x128xf32> to vector<1x8x128xf32>
    tpu.vector_store %arg10[%c0_88, %c0_89, %c0_90], %117 {strides = array<i32>} : memref<2x8x128xf32, #tpu.memory_space<vmem>>, vector<1x8x128xf32>,
    %118 = arith.truncf %114 : vector<8x128xf32> to vector<8x128xbf16>
    %c0_91 = arith.constant 0 : index
    %c0_92 = arith.constant 0 : index
    %119 = vector.load %arg5[%c0_91, %c0_92] : memref<128x128xbf16, #tpu.memory_space<vmem>>, vector<128x128xbf16>
    %c0_93 = arith.constant 0 : index
    %c0_94 = arith.constant 0 : index
    %120 = vector.load %arg6[%c0_93, %c0_94] : memref<128x128xbf16, #tpu.memory_space<vmem>>, vector<128x128xbf16>
    %c0_95 = arith.constant 0 : index
    %c0_96 = arith.constant 0 : index
    %121 = vector.load %arg7[%c0_95, %c0_96] : memref<1x128xf32, #tpu.memory_space<vmem>>, vector<1x128xf32>
    %c1_97 = arith.constant 1 : index
    %c0_98 = arith.constant 0 : index
    %c0_99 = arith.constant 0 : index
    %122 = vector.load %arg10[%c1_97, %c0_98, %c0_99] : memref<2x8x128xf32, #tpu.memory_space<vmem>>, vector<1x8x128xf32>
    %123 = vector.shape_cast %122 : vector<1x8x128xf32> to vector<8x128xf32>
    %cst_100 = arith.constant dense<0.000000e+00> : vector<8x128xf32>
    %124 = tpu.matmul %118, %119, %cst_100 {dimension_numbers = #tpu.dot_dimension_numbers<[1], [0], [0], [1], [0, 0, 1, 1], [], []>} : vector<8x128xbf16>, vector<128x128xbf16>, vector<8x128xf32> -> vector<8x128xf32>
    %125 = arith.truncf %123 : vector<8x128xf32> to vector<8x128xbf16>
    %cst_101 = arith.constant dense<0.000000e+00> : vector<8x128xf32>
    %126 = tpu.matmul %125, %120, %cst_101 {dimension_numbers = #tpu.dot_dimension_numbers<[1], [0], [0], [1], [0, 0, 1, 1], [], []>} : vector<8x128xbf16>, vector<128x128xbf16>, vector<8x128xf32> -> vector<8x128xf32>
    %127 = arith.addf %124, %126 : vector<8x128xf32>
    %128 = vector.broadcast %121 : vector<1x128xf32> to vector<8x128xf32>
    %129 = arith.addf %127, %128 : vector<8x128xf32>
    %130 = math.tanh %129 : vector<8x128xf32>
    %c1_102 = arith.constant 1 : index
    %c0_103 = arith.constant 0 : index
    %c0_104 = arith.constant 0 : index
    %131 = vector.load %arg10[%c1_102, %c0_103, %c0_104] : memref<2x8x128xf32, #tpu.memory_space<vmem>>, vector<1x8x128xf32>
    %132 = vector.shape_cast %131 : vector<1x8x128xf32> to vector<8x128xf32>
    %133 = vector.shape_cast %130 : vector<8x128xf32> to vector<1x8x128xf32>
    tpu.vector_store %arg10[%c1_102, %c0_103, %c0_104], %133 {strides = array<i32>} : memref<2x8x128xf32, #tpu.memory_space<vmem>>, vector<1x8x128xf32>,
    %134 = arith.truncf %130 : vector<8x128xf32> to vector<8x128xbf16>
    %135 = arith.index_cast %c3_i32 : i32 to index
    %c0_105 = arith.constant 0 : index
    %c0_106 = arith.constant 0 : index
    %136 = vector.load %arg8[%135, %c0_105, %c0_106] : memref<8x8x128xbf16, #tpu.memory_space<vmem>>, vector<1x8x128xbf16>
    %137 = vector.shape_cast %136 : vector<1x8x128xbf16> to vector<8x128xbf16>
    %138 = vector.shape_cast %134 : vector<8x128xbf16> to vector<1x8x128xbf16>
    tpu.vector_store %arg8[%135, %c0_105, %c0_106], %138 {strides = array<i32>} : memref<8x8x128xbf16, #tpu.memory_space<vmem>>, vector<1x8x128xbf16>,
    %c4_i32 = arith.constant 4 : i32
    %139 = arith.index_cast %c4_i32 : i32 to index
    %c0_107 = arith.constant 0 : index
    %c0_108 = arith.constant 0 : index
    %140 = vector.load %arg2[%139, %c0_107, %c0_108] : memref<8x8x128xf32, #tpu.memory_space<vmem>>, vector<1x8x128xf32>
    %141 = vector.shape_cast %140 : vector<1x8x128xf32> to vector<8x128xf32>
    %c0_109 = arith.constant 0 : index
    %c0_110 = arith.constant 0 : index
    %c0_111 = arith.constant 0 : index
    %142 = vector.load %arg10[%c0_109, %c0_110, %c0_111] : memref<2x8x128xf32, #tpu.memory_space<vmem>>, vector<1x8x128xf32>
    %143 = vector.shape_cast %142 : vector<1x8x128xf32> to vector<8x128xf32>
    %144 = arith.truncf %143 : vector<8x128xf32> to vector<8x128xbf16>
    %c0_112 = arith.constant 0 : index
    %c0_113 = arith.constant 0 : index
    %145 = vector.load %arg4[%c0_112, %c0_113] : memref<128x128xbf16, #tpu.memory_space<vmem>>, vector<128x128xbf16>
    %cst_114 = arith.constant dense<0.000000e+00> : vector<8x128xf32>
    %146 = tpu.matmul %144, %145, %cst_114 {dimension_numbers = #tpu.dot_dimension_numbers<[1], [0], [0], [1], [0, 0, 1, 1], [], []>} : vector<8x128xbf16>, vector<128x128xbf16>, vector<8x128xf32> -> vector<8x128xf32>
    %147 = arith.addf %141, %146 : vector<8x128xf32>
    %148 = math.tanh %147 : vector<8x128xf32>
    %c0_115 = arith.constant 0 : index
    %c0_116 = arith.constant 0 : index
    %c0_117 = arith.constant 0 : index
    %149 = vector.load %arg10[%c0_115, %c0_116, %c0_117] : memref<2x8x128xf32, #tpu.memory_space<vmem>>, vector<1x8x128xf32>
    %150 = vector.shape_cast %149 : vector<1x8x128xf32> to vector<8x128xf32>
    %151 = vector.shape_cast %148 : vector<8x128xf32> to vector<1x8x128xf32>
    tpu.vector_store %arg10[%c0_115, %c0_116, %c0_117], %151 {strides = array<i32>} : memref<2x8x128xf32, #tpu.memory_space<vmem>>, vector<1x8x128xf32>,
    %152 = arith.truncf %148 : vector<8x128xf32> to vector<8x128xbf16>
    %c0_118 = arith.constant 0 : index
    %c0_119 = arith.constant 0 : index
    %153 = vector.load %arg5[%c0_118, %c0_119] : memref<128x128xbf16, #tpu.memory_space<vmem>>, vector<128x128xbf16>
    %c0_120 = arith.constant 0 : index
    %c0_121 = arith.constant 0 : index
    %154 = vector.load %arg6[%c0_120, %c0_121] : memref<128x128xbf16, #tpu.memory_space<vmem>>, vector<128x128xbf16>
    %c0_122 = arith.constant 0 : index
    %c0_123 = arith.constant 0 : index
    %155 = vector.load %arg7[%c0_122, %c0_123] : memref<1x128xf32, #tpu.memory_space<vmem>>, vector<1x128xf32>
    %c1_124 = arith.constant 1 : index
    %c0_125 = arith.constant 0 : index
    %c0_126 = arith.constant 0 : index
    %156 = vector.load %arg10[%c1_124, %c0_125, %c0_126] : memref<2x8x128xf32, #tpu.memory_space<vmem>>, vector<1x8x128xf32>
    %157 = vector.shape_cast %156 : vector<1x8x128xf32> to vector<8x128xf32>
    %cst_127 = arith.constant dense<0.000000e+00> : vector<8x128xf32>
    %158 = tpu.matmul %152, %153, %cst_127 {dimension_numbers = #tpu.dot_dimension_numbers<[1], [0], [0], [1], [0, 0, 1, 1], [], []>} : vector<8x128xbf16>, vector<128x128xbf16>, vector<8x128xf32> -> vector<8x128xf32>
    %159 = arith.truncf %157 : vector<8x128xf32> to vector<8x128xbf16>
    %cst_128 = arith.constant dense<0.000000e+00> : vector<8x128xf32>
    %160 = tpu.matmul %159, %154, %cst_128 {dimension_numbers = #tpu.dot_dimension_numbers<[1], [0], [0], [1], [0, 0, 1, 1], [], []>} : vector<8x128xbf16>, vector<128x128xbf16>, vector<8x128xf32> -> vector<8x128xf32>
    %161 = arith.addf %158, %160 : vector<8x128xf32>
    %162 = vector.broadcast %155 : vector<1x128xf32> to vector<8x128xf32>
    %163 = arith.addf %161, %162 : vector<8x128xf32>
    %164 = math.tanh %163 : vector<8x128xf32>
    %c1_129 = arith.constant 1 : index
    %c0_130 = arith.constant 0 : index
    %c0_131 = arith.constant 0 : index
    %165 = vector.load %arg10[%c1_129, %c0_130, %c0_131] : memref<2x8x128xf32, #tpu.memory_space<vmem>>, vector<1x8x128xf32>
    %166 = vector.shape_cast %165 : vector<1x8x128xf32> to vector<8x128xf32>
    %167 = vector.shape_cast %164 : vector<8x128xf32> to vector<1x8x128xf32>
    tpu.vector_store %arg10[%c1_129, %c0_130, %c0_131], %167 {strides = array<i32>} : memref<2x8x128xf32, #tpu.memory_space<vmem>>, vector<1x8x128xf32>,
    %168 = arith.truncf %164 : vector<8x128xf32> to vector<8x128xbf16>
    %169 = arith.index_cast %c4_i32 : i32 to index
    %c0_132 = arith.constant 0 : index
    %c0_133 = arith.constant 0 : index
    %170 = vector.load %arg8[%169, %c0_132, %c0_133] : memref<8x8x128xbf16, #tpu.memory_space<vmem>>, vector<1x8x128xbf16>
    %171 = vector.shape_cast %170 : vector<1x8x128xbf16> to vector<8x128xbf16>
    %172 = vector.shape_cast %168 : vector<8x128xbf16> to vector<1x8x128xbf16>
    tpu.vector_store %arg8[%169, %c0_132, %c0_133], %172 {strides = array<i32>} : memref<8x8x128xbf16, #tpu.memory_space<vmem>>, vector<1x8x128xbf16>,
    %c5_i32 = arith.constant 5 : i32
    %173 = arith.index_cast %c5_i32 : i32 to index
    %c0_134 = arith.constant 0 : index
    %c0_135 = arith.constant 0 : index
    %174 = vector.load %arg2[%173, %c0_134, %c0_135] : memref<8x8x128xf32, #tpu.memory_space<vmem>>, vector<1x8x128xf32>
    %175 = vector.shape_cast %174 : vector<1x8x128xf32> to vector<8x128xf32>
    %c0_136 = arith.constant 0 : index
    %c0_137 = arith.constant 0 : index
    %c0_138 = arith.constant 0 : index
    %176 = vector.load %arg10[%c0_136, %c0_137, %c0_138] : memref<2x8x128xf32, #tpu.memory_space<vmem>>, vector<1x8x128xf32>
    %177 = vector.shape_cast %176 : vector<1x8x128xf32> to vector<8x128xf32>
    %178 = arith.truncf %177 : vector<8x128xf32> to vector<8x128xbf16>
    %c0_139 = arith.constant 0 : index
    %c0_140 = arith.constant 0 : index
    %179 = vector.load %arg4[%c0_139, %c0_140] : memref<128x128xbf16, #tpu.memory_space<vmem>>, vector<128x128xbf16>
    %cst_141 = arith.constant dense<0.000000e+00> : vector<8x128xf32>
    %180 = tpu.matmul %178, %179, %cst_141 {dimension_numbers = #tpu.dot_dimension_numbers<[1], [0], [0], [1], [0, 0, 1, 1], [], []>} : vector<8x128xbf16>, vector<128x128xbf16>, vector<8x128xf32> -> vector<8x128xf32>
    %181 = arith.addf %175, %180 : vector<8x128xf32>
    %182 = math.tanh %181 : vector<8x128xf32>
    %c0_142 = arith.constant 0 : index
    %c0_143 = arith.constant 0 : index
    %c0_144 = arith.constant 0 : index
    %183 = vector.load %arg10[%c0_142, %c0_143, %c0_144] : memref<2x8x128xf32, #tpu.memory_space<vmem>>, vector<1x8x128xf32>
    %184 = vector.shape_cast %183 : vector<1x8x128xf32> to vector<8x128xf32>
    %185 = vector.shape_cast %182 : vector<8x128xf32> to vector<1x8x128xf32>
    tpu.vector_store %arg10[%c0_142, %c0_143, %c0_144], %185 {strides = array<i32>} : memref<2x8x128xf32, #tpu.memory_space<vmem>>, vector<1x8x128xf32>,
    %186 = arith.truncf %182 : vector<8x128xf32> to vector<8x128xbf16>
    %c0_145 = arith.constant 0 : index
    %c0_146 = arith.constant 0 : index
    %187 = vector.load %arg5[%c0_145, %c0_146] : memref<128x128xbf16, #tpu.memory_space<vmem>>, vector<128x128xbf16>
    %c0_147 = arith.constant 0 : index
    %c0_148 = arith.constant 0 : index
    %188 = vector.load %arg6[%c0_147, %c0_148] : memref<128x128xbf16, #tpu.memory_space<vmem>>, vector<128x128xbf16>
    %c0_149 = arith.constant 0 : index
    %c0_150 = arith.constant 0 : index
    %189 = vector.load %arg7[%c0_149, %c0_150] : memref<1x128xf32, #tpu.memory_space<vmem>>, vector<1x128xf32>
    %c1_151 = arith.constant 1 : index
    %c0_152 = arith.constant 0 : index
    %c0_153 = arith.constant 0 : index
    %190 = vector.load %arg10[%c1_151, %c0_152, %c0_153] : memref<2x8x128xf32, #tpu.memory_space<vmem>>, vector<1x8x128xf32>
    %191 = vector.shape_cast %190 : vector<1x8x128xf32> to vector<8x128xf32>
    %cst_154 = arith.constant dense<0.000000e+00> : vector<8x128xf32>
    %192 = tpu.matmul %186, %187, %cst_154 {dimension_numbers = #tpu.dot_dimension_numbers<[1], [0], [0], [1], [0, 0, 1, 1], [], []>} : vector<8x128xbf16>, vector<128x128xbf16>, vector<8x128xf32> -> vector<8x128xf32>
    %193 = arith.truncf %191 : vector<8x128xf32> to vector<8x128xbf16>
    %cst_155 = arith.constant dense<0.000000e+00> : vector<8x128xf32>
    %194 = tpu.matmul %193, %188, %cst_155 {dimension_numbers = #tpu.dot_dimension_numbers<[1], [0], [0], [1], [0, 0, 1, 1], [], []>} : vector<8x128xbf16>, vector<128x128xbf16>, vector<8x128xf32> -> vector<8x128xf32>
    %195 = arith.addf %192, %194 : vector<8x128xf32>
    %196 = vector.broadcast %189 : vector<1x128xf32> to vector<8x128xf32>
    %197 = arith.addf %195, %196 : vector<8x128xf32>
    %198 = math.tanh %197 : vector<8x128xf32>
    %c1_156 = arith.constant 1 : index
    %c0_157 = arith.constant 0 : index
    %c0_158 = arith.constant 0 : index
    %199 = vector.load %arg10[%c1_156, %c0_157, %c0_158] : memref<2x8x128xf32, #tpu.memory_space<vmem>>, vector<1x8x128xf32>
    %200 = vector.shape_cast %199 : vector<1x8x128xf32> to vector<8x128xf32>
    %201 = vector.shape_cast %198 : vector<8x128xf32> to vector<1x8x128xf32>
    tpu.vector_store %arg10[%c1_156, %c0_157, %c0_158], %201 {strides = array<i32>} : memref<2x8x128xf32, #tpu.memory_space<vmem>>, vector<1x8x128xf32>,
    %202 = arith.truncf %198 : vector<8x128xf32> to vector<8x128xbf16>
    %203 = arith.index_cast %c5_i32 : i32 to index
    %c0_159 = arith.constant 0 : index
    %c0_160 = arith.constant 0 : index
    %204 = vector.load %arg8[%203, %c0_159, %c0_160] : memref<8x8x128xbf16, #tpu.memory_space<vmem>>, vector<1x8x128xbf16>
    %205 = vector.shape_cast %204 : vector<1x8x128xbf16> to vector<8x128xbf16>
    %206 = vector.shape_cast %202 : vector<8x128xbf16> to vector<1x8x128xbf16>
    tpu.vector_store %arg8[%203, %c0_159, %c0_160], %206 {strides = array<i32>} : memref<8x8x128xbf16, #tpu.memory_space<vmem>>, vector<1x8x128xbf16>,
    %c6_i32 = arith.constant 6 : i32
    %207 = arith.index_cast %c6_i32 : i32 to index
    %c0_161 = arith.constant 0 : index
    %c0_162 = arith.constant 0 : index
    %208 = vector.load %arg2[%207, %c0_161, %c0_162] : memref<8x8x128xf32, #tpu.memory_space<vmem>>, vector<1x8x128xf32>
    %209 = vector.shape_cast %208 : vector<1x8x128xf32> to vector<8x128xf32>
    %c0_163 = arith.constant 0 : index
    %c0_164 = arith.constant 0 : index
    %c0_165 = arith.constant 0 : index
    %210 = vector.load %arg10[%c0_163, %c0_164, %c0_165] : memref<2x8x128xf32, #tpu.memory_space<vmem>>, vector<1x8x128xf32>
    %211 = vector.shape_cast %210 : vector<1x8x128xf32> to vector<8x128xf32>
    %212 = arith.truncf %211 : vector<8x128xf32> to vector<8x128xbf16>
    %c0_166 = arith.constant 0 : index
    %c0_167 = arith.constant 0 : index
    %213 = vector.load %arg4[%c0_166, %c0_167] : memref<128x128xbf16, #tpu.memory_space<vmem>>, vector<128x128xbf16>
    %cst_168 = arith.constant dense<0.000000e+00> : vector<8x128xf32>
    %214 = tpu.matmul %212, %213, %cst_168 {dimension_numbers = #tpu.dot_dimension_numbers<[1], [0], [0], [1], [0, 0, 1, 1], [], []>} : vector<8x128xbf16>, vector<128x128xbf16>, vector<8x128xf32> -> vector<8x128xf32>
    %215 = arith.addf %209, %214 : vector<8x128xf32>
    %216 = math.tanh %215 : vector<8x128xf32>
    %c0_169 = arith.constant 0 : index
    %c0_170 = arith.constant 0 : index
    %c0_171 = arith.constant 0 : index
    %217 = vector.load %arg10[%c0_169, %c0_170, %c0_171] : memref<2x8x128xf32, #tpu.memory_space<vmem>>, vector<1x8x128xf32>
    %218 = vector.shape_cast %217 : vector<1x8x128xf32> to vector<8x128xf32>
    %219 = vector.shape_cast %216 : vector<8x128xf32> to vector<1x8x128xf32>
    tpu.vector_store %arg10[%c0_169, %c0_170, %c0_171], %219 {strides = array<i32>} : memref<2x8x128xf32, #tpu.memory_space<vmem>>, vector<1x8x128xf32>,
    %220 = arith.truncf %216 : vector<8x128xf32> to vector<8x128xbf16>
    %c0_172 = arith.constant 0 : index
    %c0_173 = arith.constant 0 : index
    %221 = vector.load %arg5[%c0_172, %c0_173] : memref<128x128xbf16, #tpu.memory_space<vmem>>, vector<128x128xbf16>
    %c0_174 = arith.constant 0 : index
    %c0_175 = arith.constant 0 : index
    %222 = vector.load %arg6[%c0_174, %c0_175] : memref<128x128xbf16, #tpu.memory_space<vmem>>, vector<128x128xbf16>
    %c0_176 = arith.constant 0 : index
    %c0_177 = arith.constant 0 : index
    %223 = vector.load %arg7[%c0_176, %c0_177] : memref<1x128xf32, #tpu.memory_space<vmem>>, vector<1x128xf32>
    %c1_178 = arith.constant 1 : index
    %c0_179 = arith.constant 0 : index
    %c0_180 = arith.constant 0 : index
    %224 = vector.load %arg10[%c1_178, %c0_179, %c0_180] : memref<2x8x128xf32, #tpu.memory_space<vmem>>, vector<1x8x128xf32>
    %225 = vector.shape_cast %224 : vector<1x8x128xf32> to vector<8x128xf32>
    %cst_181 = arith.constant dense<0.000000e+00> : vector<8x128xf32>
    %226 = tpu.matmul %220, %221, %cst_181 {dimension_numbers = #tpu.dot_dimension_numbers<[1], [0], [0], [1], [0, 0, 1, 1], [], []>} : vector<8x128xbf16>, vector<128x128xbf16>, vector<8x128xf32> -> vector<8x128xf32>
    %227 = arith.truncf %225 : vector<8x128xf32> to vector<8x128xbf16>
    %cst_182 = arith.constant dense<0.000000e+00> : vector<8x128xf32>
    %228 = tpu.matmul %227, %222, %cst_182 {dimension_numbers = #tpu.dot_dimension_numbers<[1], [0], [0], [1], [0, 0, 1, 1], [], []>} : vector<8x128xbf16>, vector<128x128xbf16>, vector<8x128xf32> -> vector<8x128xf32>
    %229 = arith.addf %226, %228 : vector<8x128xf32>
    %230 = vector.broadcast %223 : vector<1x128xf32> to vector<8x128xf32>
    %231 = arith.addf %229, %230 : vector<8x128xf32>
    %232 = math.tanh %231 : vector<8x128xf32>
    %c1_183 = arith.constant 1 : index
    %c0_184 = arith.constant 0 : index
    %c0_185 = arith.constant 0 : index
    %233 = vector.load %arg10[%c1_183, %c0_184, %c0_185] : memref<2x8x128xf32, #tpu.memory_space<vmem>>, vector<1x8x128xf32>
    %234 = vector.shape_cast %233 : vector<1x8x128xf32> to vector<8x128xf32>
    %235 = vector.shape_cast %232 : vector<8x128xf32> to vector<1x8x128xf32>
    tpu.vector_store %arg10[%c1_183, %c0_184, %c0_185], %235 {strides = array<i32>} : memref<2x8x128xf32, #tpu.memory_space<vmem>>, vector<1x8x128xf32>,
    %236 = arith.truncf %232 : vector<8x128xf32> to vector<8x128xbf16>
    %237 = arith.index_cast %c6_i32 : i32 to index
    %c0_186 = arith.constant 0 : index
    %c0_187 = arith.constant 0 : index
    %238 = vector.load %arg8[%237, %c0_186, %c0_187] : memref<8x8x128xbf16, #tpu.memory_space<vmem>>, vector<1x8x128xbf16>
    %239 = vector.shape_cast %238 : vector<1x8x128xbf16> to vector<8x128xbf16>
    %240 = vector.shape_cast %236 : vector<8x128xbf16> to vector<1x8x128xbf16>
    tpu.vector_store %arg8[%237, %c0_186, %c0_187], %240 {strides = array<i32>} : memref<8x8x128xbf16, #tpu.memory_space<vmem>>, vector<1x8x128xbf16>,
    %c7_i32 = arith.constant 7 : i32
    %241 = arith.index_cast %c7_i32 : i32 to index
    %c0_188 = arith.constant 0 : index
    %c0_189 = arith.constant 0 : index
    %242 = vector.load %arg2[%241, %c0_188, %c0_189] : memref<8x8x128xf32, #tpu.memory_space<vmem>>, vector<1x8x128xf32>
    %243 = vector.shape_cast %242 : vector<1x8x128xf32> to vector<8x128xf32>
    %c0_190 = arith.constant 0 : index
    %c0_191 = arith.constant 0 : index
    %c0_192 = arith.constant 0 : index
    %244 = vector.load %arg10[%c0_190, %c0_191, %c0_192] : memref<2x8x128xf32, #tpu.memory_space<vmem>>, vector<1x8x128xf32>
    %245 = vector.shape_cast %244 : vector<1x8x128xf32> to vector<8x128xf32>
    %246 = arith.truncf %245 : vector<8x128xf32> to vector<8x128xbf16>
    %c0_193 = arith.constant 0 : index
    %c0_194 = arith.constant 0 : index
    %247 = vector.load %arg4[%c0_193, %c0_194] : memref<128x128xbf16, #tpu.memory_space<vmem>>, vector<128x128xbf16>
    %cst_195 = arith.constant dense<0.000000e+00> : vector<8x128xf32>
    %248 = tpu.matmul %246, %247, %cst_195 {dimension_numbers = #tpu.dot_dimension_numbers<[1], [0], [0], [1], [0, 0, 1, 1], [], []>} : vector<8x128xbf16>, vector<128x128xbf16>, vector<8x128xf32> -> vector<8x128xf32>
    %249 = arith.addf %243, %248 : vector<8x128xf32>
    %250 = math.tanh %249 : vector<8x128xf32>
    %c0_196 = arith.constant 0 : index
    %c0_197 = arith.constant 0 : index
    %c0_198 = arith.constant 0 : index
    %251 = vector.load %arg10[%c0_196, %c0_197, %c0_198] : memref<2x8x128xf32, #tpu.memory_space<vmem>>, vector<1x8x128xf32>
    %252 = vector.shape_cast %251 : vector<1x8x128xf32> to vector<8x128xf32>
    %253 = vector.shape_cast %250 : vector<8x128xf32> to vector<1x8x128xf32>
    tpu.vector_store %arg10[%c0_196, %c0_197, %c0_198], %253 {strides = array<i32>} : memref<2x8x128xf32, #tpu.memory_space<vmem>>, vector<1x8x128xf32>,
    %254 = arith.truncf %250 : vector<8x128xf32> to vector<8x128xbf16>
    %c0_199 = arith.constant 0 : index
    %c0_200 = arith.constant 0 : index
    %255 = vector.load %arg5[%c0_199, %c0_200] : memref<128x128xbf16, #tpu.memory_space<vmem>>, vector<128x128xbf16>
    %c0_201 = arith.constant 0 : index
    %c0_202 = arith.constant 0 : index
    %256 = vector.load %arg6[%c0_201, %c0_202] : memref<128x128xbf16, #tpu.memory_space<vmem>>, vector<128x128xbf16>
    %c0_203 = arith.constant 0 : index
    %c0_204 = arith.constant 0 : index
    %257 = vector.load %arg7[%c0_203, %c0_204] : memref<1x128xf32, #tpu.memory_space<vmem>>, vector<1x128xf32>
    %c1_205 = arith.constant 1 : index
    %c0_206 = arith.constant 0 : index
    %c0_207 = arith.constant 0 : index
    %258 = vector.load %arg10[%c1_205, %c0_206, %c0_207] : memref<2x8x128xf32, #tpu.memory_space<vmem>>, vector<1x8x128xf32>
    %259 = vector.shape_cast %258 : vector<1x8x128xf32> to vector<8x128xf32>
    %cst_208 = arith.constant dense<0.000000e+00> : vector<8x128xf32>
    %260 = tpu.matmul %254, %255, %cst_208 {dimension_numbers = #tpu.dot_dimension_numbers<[1], [0], [0], [1], [0, 0, 1, 1], [], []>} : vector<8x128xbf16>, vector<128x128xbf16>, vector<8x128xf32> -> vector<8x128xf32>
    %261 = arith.truncf %259 : vector<8x128xf32> to vector<8x128xbf16>
    %cst_209 = arith.constant dense<0.000000e+00> : vector<8x128xf32>
    %262 = tpu.matmul %261, %256, %cst_209 {dimension_numbers = #tpu.dot_dimension_numbers<[1], [0], [0], [1], [0, 0, 1, 1], [], []>} : vector<8x128xbf16>, vector<128x128xbf16>, vector<8x128xf32> -> vector<8x128xf32>
    %263 = arith.addf %260, %262 : vector<8x128xf32>
    %264 = vector.broadcast %257 : vector<1x128xf32> to vector<8x128xf32>
    %265 = arith.addf %263, %264 : vector<8x128xf32>
    %266 = math.tanh %265 : vector<8x128xf32>
    %c1_210 = arith.constant 1 : index
    %c0_211 = arith.constant 0 : index
    %c0_212 = arith.constant 0 : index
    %267 = vector.load %arg10[%c1_210, %c0_211, %c0_212] : memref<2x8x128xf32, #tpu.memory_space<vmem>>, vector<1x8x128xf32>
    %268 = vector.shape_cast %267 : vector<1x8x128xf32> to vector<8x128xf32>
    %269 = vector.shape_cast %266 : vector<8x128xf32> to vector<1x8x128xf32>
    tpu.vector_store %arg10[%c1_210, %c0_211, %c0_212], %269 {strides = array<i32>} : memref<2x8x128xf32, #tpu.memory_space<vmem>>, vector<1x8x128xf32>,
    %270 = arith.truncf %266 : vector<8x128xf32> to vector<8x128xbf16>
    %271 = arith.index_cast %c7_i32 : i32 to index
    %c0_213 = arith.constant 0 : index
    %c0_214 = arith.constant 0 : index
    %272 = vector.load %arg8[%271, %c0_213, %c0_214] : memref<8x8x128xbf16, #tpu.memory_space<vmem>>, vector<1x8x128xbf16>
    %273 = vector.shape_cast %272 : vector<1x8x128xbf16> to vector<8x128xbf16>
    %274 = vector.shape_cast %270 : vector<8x128xbf16> to vector<1x8x128xbf16>
    tpu.vector_store %arg8[%271, %c0_213, %c0_214], %274 {strides = array<i32>} : memref<8x8x128xbf16, #tpu.memory_space<vmem>>, vector<1x8x128xbf16>,
    %c8_i32 = arith.constant 8 : i32
    %c0_i32_215 = arith.constant 0 : i32
    %275 = arith.cmpi eq, %arg1, %c0_i32_215 : i32
    %276 = arith.extui %275 : i1 to i32
    %c0_i32_216 = arith.constant 0 : i32
    %277 = arith.cmpi ne, %276, %c0_i32_216 : i32
    scf.if %277 {
      %c0_217 = arith.constant 0 : index
      %c0_218 = arith.constant 0 : index
      %c0_219 = arith.constant 0 : index
      %278 = vector.load %arg10[%c0_217, %c0_218, %c0_219] : memref<2x8x128xf32, #tpu.memory_space<vmem>>, vector<2x8x128xf32>
      %c0_220 = arith.constant 0 : index
      %c0_221 = arith.constant 0 : index
      %c0_222 = arith.constant 0 : index
      %279 = vector.load %arg9[%c0_220, %c0_221, %c0_222] : memref<2x8x128xf32, #tpu.memory_space<vmem>>, vector<2x8x128xf32>
      tpu.vector_store %arg9[%c0_220, %c0_221, %c0_222], %278 {strides = array<i32>} : memref<2x8x128xf32, #tpu.memory_space<vmem>>, vector<2x8x128xf32>,
    } else {
    }
    return
  }
  func.func @transform_0(%arg0: i32, %arg1: i32) -> (i32, i32, i32) {
    %c0_i32 = arith.constant 0 : i32
    %c0_i32_0 = arith.constant 0 : i32
    return %arg1, %arg0, %c0_i32 : i32, i32, i32
  }
  func.func @transform_1(%arg0: i32, %arg1: i32) -> (i32, i32, i32) {
    %c0_i32 = arith.constant 0 : i32
    %c0_i32_0 = arith.constant 0 : i32
    %c0_i32_1 = arith.constant 0 : i32
    return %c0_i32, %arg0, %c0_i32_0 : i32, i32, i32
  }
  func.func @transform_2(%arg0: i32, %arg1: i32) -> (i32, i32) {
    %c0_i32 = arith.constant 0 : i32
    %c0_i32_0 = arith.constant 0 : i32
    %c0_i32_1 = arith.constant 0 : i32
    return %c0_i32, %c0_i32_0 : i32, i32
  }
  func.func @transform_3(%arg0: i32, %arg1: i32) -> (i32, i32) {
    %c0_i32 = arith.constant 0 : i32
    %c0_i32_0 = arith.constant 0 : i32
    %c0_i32_1 = arith.constant 0 : i32
    return %c0_i32, %c0_i32_0 : i32, i32
  }
  func.func @transform_4(%arg0: i32, %arg1: i32) -> (i32, i32) {
    %c0_i32 = arith.constant 0 : i32
    %c0_i32_0 = arith.constant 0 : i32
    %c0_i32_1 = arith.constant 0 : i32
    return %c0_i32, %c0_i32_0 : i32, i32
  }
  func.func @transform_5(%arg0: i32, %arg1: i32) -> (i32, i32) {
    %c0_i32 = arith.constant 0 : i32
    %c0_i32_0 = arith.constant 0 : i32
    %c0_i32_1 = arith.constant 0 : i32
    return %c0_i32, %c0_i32_0 : i32, i32
  }
  func.func @transform_6(%arg0: i32, %arg1: i32) -> (i32, i32, i32) {
    %c0_i32 = arith.constant 0 : i32
    %c0_i32_0 = arith.constant 0 : i32
    return %arg1, %arg0, %c0_i32 : i32, i32, i32
  }
  func.func @transform_7(%arg0: i32, %arg1: i32) -> (i32, i32, i32) {
    %c0_i32 = arith.constant 0 : i32
    %c0_i32_0 = arith.constant 0 : i32
    %c0_i32_1 = arith.constant 0 : i32
    return %c0_i32, %arg0, %c0_i32_0 : i32, i32, i32
  }
}

</mosaic_0001>

<bundles_post_ra>
// kernel: rnn_lm_forward.3
= control target key start
LH: loop header
LB: loop body
LE: loop exit
PB: predicated region body
PF: predicated region fallthrough
CT: control target
= control target key end

     0   :  { %s323_s1 = inlined_call_operand.vmem [shape: bf16[128,128], index: 1, kind: input, shape index: {}]   ;;  %s324_s2 = inlined_call_operand.vmem [shape: f32[1,128], index: 2, kind: input, shape index: {}]   ;;  %s325_s0 = inlined_call_operand.vmem [shape: bf16[64,128], index: 0, kind: input, shape index: {}]   ;;  %s326_s3 = inlined_call_operand.vmem [shape: f32[64,128], index: 3, kind: output, shape index: {}]  }
   0x1   :  { %v214_v0 = vld [vmem:[%s323_s1 + $0x38] sm:$0xff]  ;;  %v213_v1 = vld [vmem:[%s323_s1 + $0x30] sm:$0xff]  ;;  %v212_v2 = vld [vmem:[%s323_s1 + $0x28] sm:$0xff] }
   0x2   :  { %114 = vmatpush.bf16.msra.mxu0 %v214_v0  ;;  %215 = vmatpush.bf16.msra.mxu1 %v214_v0  ;;  %v211_v3 = vld [vmem:[%s323_s1 + $0x20] sm:$0xff]  ;;  %v210_v4 = vld [vmem:[%s323_s1 + $0x18] sm:$0xff]  ;;  %v209_v5 = vld [vmem:[%s323_s1 + $0x10] sm:$0xff] }
   0x3   :  { %216 = vmatpush.bf16.msra.mxu2 %v214_v0  ;;  %217 = vmatpush.bf16.msra.mxu3 %v214_v0  ;;  %v208_v6 = vld [vmem:[%s323_s1 + $0x8] sm:$0xff]  ;;  %v207_v7 = vld [vmem:[%s323_s1] sm:$0xff]  ;;  %v205_v10 = vld [vmem:[%s325_s0 + $0x10] sm:$0xff] }
   0x4   :  { %v203_v8 = vld [vmem:[%s325_s0] sm:$0xff]  ;;  %v204_v9 = vld [vmem:[%s325_s0 + $0x8] sm:$0xff]  ;;  %v206_v11 = vld [vmem:[%s325_s0 + $0x18] sm:$0xff] }
   0x5   :  { %v239_v12 = vld [vmem:[%s324_s2] ss:$0 sm:$0xff] }
   0x6   :  { %115 = vmatpush.bf16.msra.mxu0 %v213_v1  ;;  %218 = vmatpush.bf16.msra.mxu1 %v213_v1 }
   0x7   :  { %219 = vmatpush.bf16.msra.mxu2 %v213_v1  ;;  %220 = vmatpush.bf16.msra.mxu3 %v213_v1 }
   0xa   :  { %116 = vmatpush.bf16.msra.mxu0 %v212_v2  ;;  %221 = vmatpush.bf16.msra.mxu1 %v212_v2 }
   0xb   :  { %222 = vmatpush.bf16.msra.mxu2 %v212_v2  ;;  %223 = vmatpush.bf16.msra.mxu3 %v212_v2 }
   0xe   :  { %117 = vmatpush.bf16.msra.mxu0 %v211_v3  ;;  %224 = vmatpush.bf16.msra.mxu1 %v211_v3 }
   0xf   :  { %225 = vmatpush.bf16.msra.mxu2 %v211_v3  ;;  %226 = vmatpush.bf16.msra.mxu3 %v211_v3 }
  0x12   :  { %118 = vmatpush.bf16.msra.mxu0 %v210_v4  ;;  %227 = vmatpush.bf16.msra.mxu1 %v210_v4 }
  0x13   :  { %228 = vmatpush.bf16.msra.mxu2 %v210_v4  ;;  %229 = vmatpush.bf16.msra.mxu3 %v210_v4 }
  0x16   :  { %119 = vmatpush.bf16.msra.mxu0 %v209_v5  ;;  %230 = vmatpush.bf16.msra.mxu1 %v209_v5 }
  0x17   :  { %231 = vmatpush.bf16.msra.mxu2 %v209_v5  ;;  %232 = vmatpush.bf16.msra.mxu3 %v209_v5 }
  0x1a   :  { %120 = vmatpush.bf16.msra.mxu0 %v208_v6  ;;  %233 = vmatpush.bf16.msra.mxu1 %v208_v6 }
  0x1b   :  { %234 = vmatpush.bf16.msra.mxu2 %v208_v6  ;;  %235 = vmatpush.bf16.msra.mxu3 %v208_v6 }
  0x1e   :  { %121 = vmatpush.bf16.msra.mxu0 %v207_v7  ;;  %236 = vmatpush.bf16.msra.mxu1 %v207_v7 }
  0x1f   :  { %237 = vmatpush.bf16.msra.mxu2 %v207_v7  ;;  %238 = vmatpush.bf16.msra.mxu3 %v207_v7 }
  0x21   :  { %122 = vmatmul.bf16.vlgmr.msra.gmra.mxu0 %v203_v8  ;;  %127 = vmatmul.bf16.vlgmr.msra.gmra.mxu1 %v204_v9 }
  0x22   :  { %132 = vmatmul.bf16.vlgmr.msra.gmra.mxu2 %v205_v10  ;;  %137 = vmatmul.bf16.vlgmr.msra.gmra.mxu3 %v206_v11 }
  0x9e   :  { %v123_v13 = vpop.f32.mrf.mxu0  ;;  %v128_v14 = vpop.f32.mrf.mxu1 }
  0x9f   :  { %v124_v15 = vadd.f32 %v239_v12, %v123_v13  ;;  %v129_v16 = vadd.f32 %v239_v12, %v128_v14 }
  0xa1   :  { %143 = vst [vmem:[%s326_s3] sm:$0xff] %v124_v15 }
  0xa2   :  { %145 = vst [vmem:[%s326_s3 + $0x10] sm:$0xff] %v129_v16 }
  0xa5   :  { %v133_v17 = vpop.f32.mrf.mxu2  ;;  %v138_v18 = vpop.f32.mrf.mxu3 }
  0xa6   :  { %v134_v19 = vadd.f32 %v239_v12, %v133_v17  ;;  %v139_v20 = vadd.f32 %v239_v12, %v138_v18  ;;  %v125_v21 = vpop.f32.mrf.mxu0  ;;  %v130_v22 = vpop.f32.mrf.mxu1 }
  0xa7   :  { %v126_v23 = vadd.f32 %v239_v12, %v125_v21  ;;  %v131_v24 = vadd.f32 %v239_v12, %v130_v22 }
  0xa8   :  { %147 = vst [vmem:[%s326_s3 + $0x20] sm:$0xff] %v134_v19 }
  0xa9   :  { %149 = vst [vmem:[%s326_s3 + $0x30] sm:$0xff] %v139_v20 }
  0xaa   :  { %144 = vst [vmem:[%s326_s3 + $0x8] sm:$0xff] %v126_v23 }
  0xab   :  { %146 = vst [vmem:[%s326_s3 + $0x18] sm:$0xff] %v131_v24 }
  0xad   :  { %v135_v25 = vpop.f32.mrf.mxu2  ;;  %v140_v26 = vpop.f32.mrf.mxu3 }
  0xae   :  { %v136_v27 = vadd.f32 %v239_v12, %v135_v25  ;;  %v141_v28 = vadd.f32 %v239_v12, %v140_v26 }
  0xb0   :  { %148 = vst [vmem:[%s326_s3 + $0x28] sm:$0xff] %v136_v27 }
  0xb1   :  { %150 = vst [vmem:[%s326_s3 + $0x38] sm:$0xff] %v141_v28 }

// kernel: rnn_lm_forward.4
= control target key start
LH: loop header
LB: loop body
LE: loop exit
PB: predicated region body
PF: predicated region fallthrough
CT: control target
= control target key end

     0   :  { %s3769_s2 = inlined_call_operand.vmem [shape: bf16[128,128], index: 2, kind: input, shape index: {}]   ;;  %s3770_s4 = inlined_call_operand.vmem [shape: bf16[128,128], index: 4, kind: input, shape index: {}]   ;;  %s3771_s3 = inlined_call_operand.vmem [shape: bf16[128,128], index: 3, kind: input, shape index: {}]   ;;  %s3772_s1 = inlined_call_operand.vmem [shape: f32[2,8,128], index: 1, kind: input, shape index: {}]   ;;  %s3773_s5 = inlined_call_operand.vmem [shape: f32[1,128], index: 5, kind: input, shape index: {}]   ;;  %s3774_s0 = inlined_call_operand.vmem [shape: f32[8,8,128], index: 0, kind: input, shape index: {}]   ;;  %s3775_s6 = inlined_call_operand.vmem [shape: bf16[8,8,128], index: 6, kind: output, shape index: {0}]   ;;  %s3776_s7 = inlined_call_operand.vmem [shape: f32[2,8,128], index: 7, kind: output, shape index: {1}]  }
   0x1   :  { %v2844_v0 = vld [vmem:[%s3769_s2 + $0x38] sm:$0xff]  ;;  %v2843_v1 = vld [vmem:[%s3769_s2 + $0x30] sm:$0xff]  ;;  %v2842_v7 = vld [vmem:[%s3769_s2 + $0x28] sm:$0xff] }
   0x2   :  { %100 = vmatpush.bf16.msra.mxu0 %v2844_v0  ;;  %v2860_v2 = vld [vmem:[%s3770_s4 + $0x38] sm:$0xff]  ;;  %v2859_v5 = vld [vmem:[%s3770_s4 + $0x30] sm:$0xff]  ;;  %v2858_v9 = vld [vmem:[%s3770_s4 + $0x28] sm:$0xff] }
   0x3   :  { %v2852_v3 = vld [vmem:[%s3771_s3 + $0x38] sm:$0xff]  ;;  %201 = vmatpush.bf16.msra.mxu1 %v2860_v2  ;;  %v2851_v6 = vld [vmem:[%s3771_s3 + $0x30] sm:$0xff]  ;;  %v2850_v10 = vld [vmem:[%s3771_s3 + $0x28] sm:$0xff] }
   0x4   :  { %v2868_v4 = vld [vmem:[%s3769_s2 + $0x38] sm:$0xff]  ;;  %262 = vmatpush.bf16.msra.mxu2 %v2852_v3  ;;  %v2867_v8 = vld [vmem:[%s3769_s2 + $0x30] sm:$0xff]  ;;  %v2841_v11 = vld [vmem:[%s3769_s2 + $0x20] sm:$0xff] }
   0x5   :  { %351 = vmatpush.bf16.msra.mxu3 %v2868_v4  ;;  %v2866_v12 = vld [vmem:[%s3769_s2 + $0x28] sm:$0xff]  ;;  %v2857_v13 = vld [vmem:[%s3770_s4 + $0x20] sm:$0xff]  ;;  %v2840_v15 = vld [vmem:[%s3769_s2 + $0x18] sm:$0xff] }
   0x6   :  { %101 = vmatpush.bf16.msra.mxu0 %v2843_v1  ;;  %v2849_v14 = vld [vmem:[%s3771_s3 + $0x20] sm:$0xff]  ;;  %v2856_v17 = vld [vmem:[%s3770_s4 + $0x18] sm:$0xff]  ;;  %v2839_v19 = vld [vmem:[%s3769_s2 + $0x10] sm:$0xff] }
   0x7   :  { %202 = vmatpush.bf16.msra.mxu1 %v2859_v5  ;;  %v2865_v16 = vld [vmem:[%s3769_s2 + $0x20] sm:$0xff]  ;;  %v2848_v18 = vld [vmem:[%s3771_s3 + $0x18] sm:$0xff]  ;;  %v2855_v21 = vld [vmem:[%s3770_s4 + $0x10] sm:$0xff] }
   0x8   :  { %263 = vmatpush.bf16.msra.mxu2 %v2851_v6  ;;  %v2864_v20 = vld [vmem:[%s3769_s2 + $0x18] sm:$0xff]  ;;  %v2838_v22 = vld [vmem:[%s3769_s2 + $0x8] sm:$0xff]  ;;  %v2837_v23 = vld [vmem:[%s3769_s2] sm:$0xff] }
   0x9   :  { %352 = vmatpush.bf16.msra.mxu3 %v2867_v8  ;;  %v29_v24 = vld [vmem:[%s3772_s1] sm:$0xff]  ;;  %v2847_v26 = vld [vmem:[%s3771_s3 + $0x10] sm:$0xff]  ;;  %v2854_v28 = vld [vmem:[%s3770_s4 + $0x8] sm:$0xff] }
   0xa   :  { %102 = vmatpush.bf16.msra.mxu0 %v2842_v7  ;;  %v35_v25 = vpack.c.bf16 %v29_v24, %v29_v24  ;;  %v2863_v27 = vld [vmem:[%s3769_s2 + $0x10] sm:$0xff]  ;;  %v2846_v29 = vld [vmem:[%s3771_s3 + $0x8] sm:$0xff]  ;;  %v2853_v31 = vld [vmem:[%s3770_s4] sm:$0xff] }
   0xb   :  { %203 = vmatpush.bf16.msra.mxu1 %v2858_v9  ;;  %v2862_v30 = vld [vmem:[%s3769_s2 + $0x8] sm:$0xff]  ;;  %v2845_v32 = vld [vmem:[%s3771_s3] sm:$0xff]  ;;  %v2876_v36 = vld [vmem:[%s3771_s3 + $0x38] sm:$0xff] }
   0xc   :  { %264 = vmatpush.bf16.msra.mxu2 %v2850_v10  ;;  %v2861_v33 = vld [vmem:[%s3769_s2] sm:$0xff]  ;;  %v30_v34 = vld [vmem:[%s3772_s1 + $0x8] sm:$0xff]  ;;  %v2892_v37 = vld [vmem:[%s3769_s2 + $0x38] sm:$0xff] }
   0xd   :  { %353 = vmatpush.bf16.msra.mxu3 %v2866_v12  ;;  %v152_v35 = vpack.c.bf16 %v30_v34, %v30_v34  ;;  %v2884_v38 = vld [vmem:[%s3770_s4 + $0x38] sm:$0xff]  ;;  %v2875_v39 = vld [vmem:[%s3771_s3 + $0x30] sm:$0xff]  ;;  %v2874_v42 = vld [vmem:[%s3771_s3 + $0x28] sm:$0xff] }
   0xe   :  { %103 = vmatpush.bf16.msra.mxu0 %v2841_v11  ;;  %v2891_v40 = vld [vmem:[%s3769_s2 + $0x30] sm:$0xff]  ;;  %v2890_v43 = vld [vmem:[%s3769_s2 + $0x28] sm:$0xff]  ;;  %v33_v45 = vld [vmem:[%s3774_s0] sm:$0xff] }
   0xf   :  { %204 = vmatpush.bf16.msra.mxu1 %v2857_v13  ;;  %v2883_v41 = vld [vmem:[%s3770_s4 + $0x30] sm:$0xff]  ;;  %v2882_v44 = vld [vmem:[%s3770_s4 + $0x28] sm:$0xff]  ;;  %v2873_v51 = vld [vmem:[%s3771_s3 + $0x20] sm:$0xff] }
  0x10   :  { %265 = vmatpush.bf16.msra.mxu2 %v2849_v14  ;;  %v2889_v52 = vld [vmem:[%s3769_s2 + $0x20] sm:$0xff]  ;;  %v2872_v54 = vld [vmem:[%s3771_s3 + $0x18] sm:$0xff]  ;;  %v2871_v58 = vld [vmem:[%s3771_s3 + $0x10] sm:$0xff] }
  0x11   :  { %354 = vmatpush.bf16.msra.mxu3 %v2865_v16  ;;  %v2881_v53 = vld [vmem:[%s3770_s4 + $0x20] sm:$0xff]  ;;  %v2888_v55 = vld [vmem:[%s3769_s2 + $0x18] sm:$0xff]  ;;  %v2887_v59 = vld [vmem:[%s3769_s2 + $0x10] sm:$0xff] }
  0x12   :  { %104 = vmatpush.bf16.msra.mxu0 %v2840_v15  ;;  %v2880_v56 = vld [vmem:[%s3770_s4 + $0x18] sm:$0xff]  ;;  %v2879_v61 = vld [vmem:[%s3770_s4 + $0x10] sm:$0xff]  ;;  %v2870_v62 = vld [vmem:[%s3771_s3 + $0x8] sm:$0xff] }
  0x13   :  { %205 = vmatpush.bf16.msra.mxu1 %v2856_v17  ;;  %v2886_v63 = vld [vmem:[%s3769_s2 + $0x8] sm:$0xff]  ;;  %v2869_v1 = vld [vmem:[%s3771_s3] sm:$0xff]  ;;  %v2908_v4 = vld [vmem:[%s3770_s4 + $0x38] sm:$0xff] }
  0x14   :  { %266 = vmatpush.bf16.msra.mxu2 %v2848_v18  ;;  %v2878_v0 = vld [vmem:[%s3770_s4 + $0x8] sm:$0xff]  ;;  %v2885_v2 = vld [vmem:[%s3769_s2] sm:$0xff]  ;;  %v2900_v5 = vld [vmem:[%s3771_s3 + $0x38] sm:$0xff] }
  0x15   :  { %355 = vmatpush.bf16.msra.mxu3 %v2864_v20  ;;  %v2877_v3 = vld [vmem:[%s3770_s4] sm:$0xff]  ;;  %v2916_v6 = vld [vmem:[%s3769_s2 + $0x38] sm:$0xff]  ;;  %v2907_v7 = vld [vmem:[%s3770_s4 + $0x30] sm:$0xff] }
  0x16   :  { %105 = vmatpush.bf16.msra.mxu0 %v2839_v19  ;;  %v2899_v8 = vld [vmem:[%s3771_s3 + $0x30] sm:$0xff]  ;;  %v2906_v10 = vld [vmem:[%s3770_s4 + $0x28] sm:$0xff]  ;;  %v2905_v13 = vld [vmem:[%s3770_s4 + $0x20] sm:$0xff] }
  0x17   :  { %206 = vmatpush.bf16.msra.mxu1 %v2855_v21  ;;  %v2915_v9 = vld [vmem:[%s3769_s2 + $0x30] sm:$0xff]  ;;  %v2898_v11 = vld [vmem:[%s3771_s3 + $0x28] sm:$0xff]  ;;  %v2897_v14 = vld [vmem:[%s3771_s3 + $0x20] sm:$0xff] }
  0x18   :  { %267 = vmatpush.bf16.msra.mxu2 %v2847_v26  ;;  %v2914_v12 = vld [vmem:[%s3769_s2 + $0x28] sm:$0xff]  ;;  %v2913_v15 = vld [vmem:[%s3769_s2 + $0x20] sm:$0xff]  ;;  %v2911_v34 = vld [vmem:[%s3769_s2 + $0x10] sm:$0xff] }
  0x19   :  { %356 = vmatpush.bf16.msra.mxu3 %v2863_v27  ;;  %v2151_v16 = vld [vmem:[%s3774_s0 + $0x8] sm:$0xff]  ;;  %v3029_v17 = vld [vmem:[%s3773_s5] ss:$0 sm:$0xff] }
  0x1a   :  { %106 = vmatpush.bf16.msra.mxu0 %v2838_v22 }
  0x1b   :  { %207 = vmatpush.bf16.msra.mxu1 %v2854_v28 }
  0x1c   :  { %268 = vmatpush.bf16.msra.mxu2 %v2846_v29  ;;  %v2904_v29 = vld [vmem:[%s3770_s4 + $0x18] sm:$0xff] }
  0x1d   :  { %357 = vmatpush.bf16.msra.mxu3 %v2862_v30  ;;  %v2896_v30 = vld [vmem:[%s3771_s3 + $0x18] sm:$0xff] }
  0x1e   :  { %107 = vmatpush.bf16.msra.mxu0 %v2837_v23 }
  0x1f   :  { %208 = vmatpush.bf16.msra.mxu1 %v2853_v31  ;;  %v2912_v31 = vld [vmem:[%s3769_s2 + $0x18] sm:$0xff] }
  0x20   :  { %269 = vmatpush.bf16.msra.mxu2 %v2845_v32  ;;  %v2903_v32 = vld [vmem:[%s3770_s4 + $0x10] sm:$0xff] }
  0x21   :  { %108 = vmatmul.bf16.vlgmr.msra.gmra.mxu0 %v35_v25  ;;  %358 = vmatpush.bf16.msra.mxu3 %v2861_v33  ;;  %v2895_v33 = vld [vmem:[%s3771_s3 + $0x10] sm:$0xff] }
  0x22   :  { %209 = vmatmul.bf16.vlgmr.msra.gmra.mxu1 %v152_v35  ;;  %451 = vmatpush.bf16.msrb.mxu0 %v2884_v38  ;;  %v2902_v35 = vld [vmem:[%s3770_s4 + $0x8] sm:$0xff]  ;;  %v2901_v38 = vld [vmem:[%s3770_s4] sm:$0xff] }
  0x23   :  { %512 = vmatpush.bf16.msrb.mxu1 %v2876_v36  ;;  %v2894_v36 = vld [vmem:[%s3771_s3 + $0x8] sm:$0xff] }
  0x24   :  { %602 = vmatpush.bf16.msrb.mxu2 %v2892_v37  ;;  %v2910_v37 = vld [vmem:[%s3769_s2 + $0x8] sm:$0xff] }
  0x25   :  { %702 = vmatpush.bf16.msrb.mxu3 %v2908_v4 }
  0x26   :  { %452 = vmatpush.bf16.msrb.mxu0 %v2883_v41  ;;  %v2924_v41 = vld [vmem:[%s3771_s3 + $0x38] sm:$0xff] }
  0x27   :  { %513 = vmatpush.bf16.msrb.mxu1 %v2875_v39  ;;  %v2893_v39 = vld [vmem:[%s3771_s3] sm:$0xff] }
  0x28   :  { %603 = vmatpush.bf16.msrb.mxu2 %v2891_v40  ;;  %v2909_v40 = vld [vmem:[%s3769_s2] sm:$0xff] }
  0x29   :  { %703 = vmatpush.bf16.msrb.mxu3 %v2907_v7  ;;  %v2935_v7 = vld [vmem:[%s3769_s2 + $0x10] sm:$0xff] }
  0x2a   :  { %453 = vmatpush.bf16.msrb.mxu0 %v2882_v44  ;;  %v2923_v44 = vld [vmem:[%s3771_s3 + $0x30] sm:$0xff] }
  0x2b   :  { %514 = vmatpush.bf16.msrb.mxu1 %v2874_v42  ;;  %v2940_v42 = vld [vmem:[%s3769_s2 + $0x38] sm:$0xff] }
  0x2c   :  { %604 = vmatpush.bf16.msrb.mxu2 %v2890_v43  ;;  %v2932_v43 = vld [vmem:[%s3770_s4 + $0x38] sm:$0xff] }
  0x2d   :  { %704 = vmatpush.bf16.msrb.mxu3 %v2906_v10  ;;  %v2934_v10 = vld [vmem:[%s3769_s2 + $0x8] sm:$0xff] }
  0x2e   :  { %454 = vmatpush.bf16.msrb.mxu0 %v2881_v53 }
  0x2f   :  { %515 = vmatpush.bf16.msrb.mxu1 %v2873_v51  ;;  %v2937_v51 = vld [vmem:[%s3769_s2 + $0x20] sm:$0xff] }
  0x30   :  { %605 = vmatpush.bf16.msrb.mxu2 %v2889_v52  ;;  %v2929_v52 = vld [vmem:[%s3770_s4 + $0x20] sm:$0xff] }
  0x31   :  { %705 = vmatpush.bf16.msrb.mxu3 %v2905_v13  ;;  %v2933_v13 = vld [vmem:[%s3769_s2] sm:$0xff] }
  0x32   :  { %455 = vmatpush.bf16.msrb.mxu0 %v2880_v56  ;;  %v3030_v56 = vld [vmem:[%s3773_s5] ss:$0 sm:$0xff] }
  0x33   :  { %516 = vmatpush.bf16.msrb.mxu1 %v2872_v54  ;;  %v2920_v54 = vld [vmem:[%s3771_s3 + $0x18] sm:$0xff] }
  0x34   :  { %606 = vmatpush.bf16.msrb.mxu2 %v2888_v55  ;;  %v2936_v55 = vld [vmem:[%s3769_s2 + $0x18] sm:$0xff] }
  0x35   :  { %706 = vmatpush.bf16.msrb.mxu3 %v2904_v29  ;;  %v2944_v29 = vld [vmem:[%s3771_s3 + $0x18] sm:$0xff] }
  0x36   :  { %456 = vmatpush.bf16.msrb.mxu0 %v2879_v61 }
  0x37   :  { %517 = vmatpush.bf16.msrb.mxu1 %v2871_v58 }
  0x38   :  { %607 = vmatpush.bf16.msrb.mxu2 %v2887_v59  ;;  %v2249_v59 = vld [vmem:[%s3774_s0 + $0x10] sm:$0xff] }
  0x39   :  { %707 = vmatpush.bf16.msrb.mxu3 %v2903_v32  ;;  %v3031_v32 = vld [vmem:[%s3773_s5] ss:$0 sm:$0xff] }
  0x3a   :  { %457 = vmatpush.bf16.msrb.mxu0 %v2878_v0 }
  0x3b   :  { %518 = vmatpush.bf16.msrb.mxu1 %v2870_v62 }
  0x3c   :  { %608 = vmatpush.bf16.msrb.mxu2 %v2886_v63 }
  0x3d   :  { %708 = vmatpush.bf16.msrb.mxu3 %v2902_v35 }
  0x3e   :  { %458 = vmatpush.bf16.msrb.mxu0 %v2877_v3 }
  0x3f   :  { %519 = vmatpush.bf16.msrb.mxu1 %v2869_v1 }
  0x40   :  { %609 = vmatpush.bf16.msrb.mxu2 %v2885_v2 }
  0x41   :  { %709 = vmatpush.bf16.msrb.mxu3 %v2901_v38 }
  0x42   :  { %763 = vmatpush.bf16.msra.mxu0 %v2900_v5 }
  0x43   :  { %853 = vmatpush.bf16.msra.mxu1 %v2916_v6  ;;  %v2919_v6 = vld [vmem:[%s3771_s3 + $0x10] sm:$0xff] }
  0x46   :  { %764 = vmatpush.bf16.msra.mxu0 %v2899_v8  ;;  %v2928_v8 = vld [vmem:[%s3770_s4 + $0x18] sm:$0xff] }
  0x47   :  { %854 = vmatpush.bf16.msra.mxu1 %v2915_v9  ;;  %v2918_v9 = vld [vmem:[%s3771_s3 + $0x8] sm:$0xff] }
  0x4a   :  { %765 = vmatpush.bf16.msra.mxu0 %v2898_v11  ;;  %v2927_v11 = vld [vmem:[%s3770_s4 + $0x10] sm:$0xff] }
  0x4b   :  { %855 = vmatpush.bf16.msra.mxu1 %v2914_v12  ;;  %v2917_v12 = vld [vmem:[%s3771_s3] sm:$0xff] }
  0x4e   :  { %766 = vmatpush.bf16.msra.mxu0 %v2897_v14  ;;  %v2926_v14 = vld [vmem:[%s3770_s4 + $0x8] sm:$0xff] }
  0x4f   :  { %856 = vmatpush.bf16.msra.mxu1 %v2913_v15  ;;  %v2925_v15 = vld [vmem:[%s3770_s4] sm:$0xff] }
  0x52   :  { %767 = vmatpush.bf16.msra.mxu0 %v2896_v30  ;;  %v2960_v30 = vld [vmem:[%s3769_s2 + $0x18] sm:$0xff] }
  0x53   :  { %857 = vmatpush.bf16.msra.mxu1 %v2912_v31 }
  0x56   :  { %768 = vmatpush.bf16.msra.mxu0 %v2895_v33 }
  0x57   :  { %858 = vmatpush.bf16.msra.mxu1 %v2911_v34 }
  0x5a   :  { %769 = vmatpush.bf16.msra.mxu0 %v2894_v36 }
  0x5b   :  { %859 = vmatpush.bf16.msra.mxu1 %v2910_v37 }
  0x5e   :  { %770 = vmatpush.bf16.msra.mxu0 %v2893_v39 }
  0x5f   :  { %860 = vmatpush.bf16.msra.mxu1 %v2909_v40 }
  0x9e   :  { %v109_v46 = vpop.f32.mrf.mxu0 }
  0x9f   :  { %v113_v47 = vadd.f32 %v109_v46, %v33_v45  ;;  %v210_v57 = vpop.f32.mrf.mxu1  ;;  %v2939_v45 = vld [vmem:[%s3769_s2 + $0x30] sm:$0xff] }
  0xa0   :  { %v2931_v46 = vld [vmem:[%s3770_s4 + $0x30] sm:$0xff] }
  0xa1   :  { %3037 = vtanh.f32 %v113_v47  ;;  %v2922_v47 = vld [vmem:[%s3771_s3 + $0x28] sm:$0xff] }
  0xa6   :  { %v111_v48 = vpop.f32.mrf.mxu0 }
  0xa7   :  { %v3038_v49 = vpop.eup %3037  ;;  %v212_v60 = vpop.f32.mrf.mxu1  ;;  %v2938_v48 = vld [vmem:[%s3769_s2 + $0x28] sm:$0xff] }
  0xa8   :  { %v116_v50 = vpack.c.bf16 %v3038_v49, %v3038_v49  ;;  %v2930_v49 = vld [vmem:[%s3770_s4 + $0x28] sm:$0xff] }
  0xaa   :  { %270 = vmatmul.bf16.vlgmr.msra.gmra.mxu2 %v116_v50  ;;  %359 = vmatmul.bf16.vlgmr.msra.gmra.mxu3 %v116_v50  ;;  %v2921_v50 = vld [vmem:[%s3771_s3 + $0x20] sm:$0xff] }
  0xab   :  { %1014 = vmatpush.bf16.msra.mxu3 %v2924_v41  ;;  %953 = vmatpush.bf16.msra.mxu2 %v2932_v43  ;;  %v2943_v43 = vld [vmem:[%s3771_s3 + $0x10] sm:$0xff] }
  0xaf   :  { %1015 = vmatpush.bf16.msra.mxu3 %v2923_v44  ;;  %954 = vmatpush.bf16.msra.mxu2 %v2931_v46  ;;  %v2959_v44 = vld [vmem:[%s3769_s2 + $0x10] sm:$0xff]  ;;  %v2942_v46 = vld [vmem:[%s3771_s3 + $0x8] sm:$0xff] }
  0xb3   :  { %1016 = vmatpush.bf16.msra.mxu3 %v2922_v47  ;;  %955 = vmatpush.bf16.msra.mxu2 %v2930_v49  ;;  %v2958_v47 = vld [vmem:[%s3769_s2 + $0x8] sm:$0xff]  ;;  %v2941_v49 = vld [vmem:[%s3771_s3] sm:$0xff] }
  0xb7   :  { %1017 = vmatpush.bf16.msra.mxu3 %v2921_v50  ;;  %956 = vmatpush.bf16.msra.mxu2 %v2929_v52  ;;  %v2957_v50 = vld [vmem:[%s3769_s2] sm:$0xff]  ;;  %v2951_v52 = vld [vmem:[%s3770_s4 + $0x10] sm:$0xff] }
  0xbb   :  { %1018 = vmatpush.bf16.msra.mxu3 %v2920_v54  ;;  %957 = vmatpush.bf16.msra.mxu2 %v2928_v8  ;;  %v2949_v54 = vld [vmem:[%s3770_s4] sm:$0xff]  ;;  %v2968_v8 = vld [vmem:[%s3771_s3 + $0x18] sm:$0xff] }
  0xbf   :  { %1019 = vmatpush.bf16.msra.mxu3 %v2919_v6  ;;  %958 = vmatpush.bf16.msra.mxu2 %v2927_v11  ;;  %v3032_v11 = vld [vmem:[%s3773_s5] ss:$0 sm:$0xff] }
  0xc3   :  { %1020 = vmatpush.bf16.msra.mxu3 %v2918_v9  ;;  %959 = vmatpush.bf16.msra.mxu2 %v2926_v14  ;;  %v2984_v9 = vld [vmem:[%s3769_s2 + $0x18] sm:$0xff] }
  0xc7   :  { %1021 = vmatpush.bf16.msra.mxu3 %v2917_v12  ;;  %960 = vmatpush.bf16.msra.mxu2 %v2925_v15 }
 0x12d   :  { %v271_v18 = vpop.f32.mrf.mxu2  ;;  %v360_v19 = vpop.f32.mrf.mxu3 }
 0x12e   :  { %v272_v20 = vadd.f32 %v271_v18, %v210_v57  ;;  %v364_v21 = vadd.f32 %v2151_v16, %v360_v19  ;;  %v2948_v16 = vld [vmem:[%s3771_s3 + $0x38] sm:$0xff]  ;;  %v2947_v18 = vld [vmem:[%s3771_s3 + $0x30] sm:$0xff] }
 0x12f   :  { %v2963_v19 = vld [vmem:[%s3769_s2 + $0x30] sm:$0xff] }
 0x130   :  { %v278_v22 = vadd.f32 %v3029_v17, %v272_v20  ;;  %3039 = vtanh.f32 %v364_v21  ;;  %v2964_v17 = vld [vmem:[%s3769_s2 + $0x38] sm:$0xff]  ;;  %v2955_v21 = vld [vmem:[%s3770_s4 + $0x30] sm:$0xff] }
 0x131   :  { %v2956_v20 = vld [vmem:[%s3770_s4 + $0x38] sm:$0xff] }
 0x132   :  { %3041 = vtanh.f32 %v278_v22  ;;  %v2946_v22 = vld [vmem:[%s3771_s3 + $0x28] sm:$0xff] }
 0x135   :  { %v273_v23 = vpop.f32.mrf.mxu2  ;;  %v362_v24 = vpop.f32.mrf.mxu3 }
 0x136   :  { %v3040_v25 = vpop.eup %3039  ;;  %v2962_v23 = vld [vmem:[%s3769_s2 + $0x28] sm:$0xff]  ;;  %v2945_v24 = vld [vmem:[%s3771_s3 + $0x20] sm:$0xff] }
 0x137   :  { %v367_v26 = vpack.c.bf16 %v3040_v25, %v3040_v25  ;;  %v2961_v25 = vld [vmem:[%s3769_s2 + $0x20] sm:$0xff] }
 0x138   :  { %v3042_v27 = vpop.eup %3041 }
 0x139   :  { %520 = vmatmul.bf16.vlgmr.msrb.gmra.mxu1 %v367_v26  ;;  %610 = vmatmul.bf16.vlgmr.msrb.gmra.mxu2 %v367_v26  ;;  %v281_v28 = vpack.c.bf16 %v3042_v27, %v3042_v27  ;;  %v2347_v26 = vld [vmem:[%s3774_s0 + $0x18] sm:$0xff] }
 0x13a   :  { %1265 = vmatpush.bf16.msrb.mxu2 %v2948_v16  ;;  %1204 = vmatpush.bf16.msrb.mxu1 %v2956_v20  ;;  %v2983_v20 = vld [vmem:[%s3769_s2 + $0x10] sm:$0xff] }
 0x13b   :  { %282 = vst [vmem:[%s3775_s6] sm:$0xf] %v281_v28  ;;  %459 = vmatmul.bf16.vlgmr.msrb.gmra.mxu0 %v281_v28 }
 0x13c   :  { %1104 = vmatpush.bf16.msrb.mxu0 %v2940_v42 }
 0x13e   :  { %1266 = vmatpush.bf16.msrb.mxu2 %v2947_v18  ;;  %1205 = vmatpush.bf16.msrb.mxu1 %v2955_v21  ;;  %v2977_v21 = vld [vmem:[%s3770_s4 + $0x20] sm:$0xff] }
 0x140   :  { %1105 = vmatpush.bf16.msrb.mxu0 %v2939_v45  ;;  %v2954_v45 = vld [vmem:[%s3770_s4 + $0x28] sm:$0xff] }
 0x142   :  { %1267 = vmatpush.bf16.msrb.mxu2 %v2946_v22  ;;  %1206 = vmatpush.bf16.msrb.mxu1 %v2954_v45  ;;  %v2966_v22 = vld [vmem:[%s3771_s3 + $0x8] sm:$0xff] }
 0x144   :  { %1106 = vmatpush.bf16.msrb.mxu0 %v2938_v48  ;;  %v2953_v48 = vld [vmem:[%s3770_s4 + $0x20] sm:$0xff] }
 0x146   :  { %1268 = vmatpush.bf16.msrb.mxu2 %v2945_v24  ;;  %1207 = vmatpush.bf16.msrb.mxu1 %v2953_v48  ;;  %v2976_v24 = vld [vmem:[%s3770_s4 + $0x18] sm:$0xff] }
 0x148   :  { %1107 = vmatpush.bf16.msrb.mxu0 %v2937_v51  ;;  %v2952_v51 = vld [vmem:[%s3770_s4 + $0x18] sm:$0xff] }
 0x14a   :  { %1269 = vmatpush.bf16.msrb.mxu2 %v2944_v29  ;;  %1208 = vmatpush.bf16.msrb.mxu1 %v2952_v51  ;;  %v2973_v29 = vld [vmem:[%s3770_s4] sm:$0xff] }
 0x14c   :  { %1108 = vmatpush.bf16.msrb.mxu0 %v2936_v55  ;;  %v2972_v55 = vld [vmem:[%s3771_s3 + $0x38] sm:$0xff] }
 0x14e   :  { %1270 = vmatpush.bf16.msrb.mxu2 %v2943_v43  ;;  %1209 = vmatpush.bf16.msrb.mxu1 %v2951_v52 }
 0x150   :  { %1109 = vmatpush.bf16.msrb.mxu0 %v2935_v7 }
 0x152   :  { %1271 = vmatpush.bf16.msrb.mxu2 %v2942_v46 }
 0x154   :  { %1110 = vmatpush.bf16.msrb.mxu0 %v2934_v10 }
 0x156   :  { %1272 = vmatpush.bf16.msrb.mxu2 %v2941_v49 }
 0x158   :  { %1111 = vmatpush.bf16.msrb.mxu0 %v2933_v13 }
 0x1b6   :  { %v521_v53 = vpop.f32.mrf.mxu1 }
 0x1b8   :  { %v460_v57 = vpop.f32.mrf.mxu0 }
 0x1b9   :  { %v522_v58 = vadd.f32 %v521_v53, %v460_v57  ;;  %v2950_v53 = vld [vmem:[%s3770_s4 + $0x8] sm:$0xff]  ;;  %v2971_v57 = vld [vmem:[%s3771_s3 + $0x30] sm:$0xff] }
 0x1ba   :  { %1210 = vmatpush.bf16.msrb.mxu1 %v2950_v53 }
 0x1bb   :  { %v528_v60 = vadd.f32 %v3030_v56, %v522_v58  ;;  %v2988_v56 = vld [vmem:[%s3769_s2 + $0x38] sm:$0xff]  ;;  %v2987_v58 = vld [vmem:[%s3769_s2 + $0x30] sm:$0xff] }
 0x1bc   :  { %v611_v61 = vpop.f32.mrf.mxu2 }
 0x1bd   :  { %3043 = vtanh.f32 %v528_v60  ;;  %v615_v62 = vadd.f32 %v2249_v59, %v611_v61  ;;  %v2980_v59 = vld [vmem:[%s3770_s4 + $0x38] sm:$0xff]  ;;  %v2445_v60 = vld [vmem:[%s3774_s0 + $0x20] sm:$0xff]  ;;  %v2979_v61 = vld [vmem:[%s3770_s4 + $0x30] sm:$0xff] }
 0x1be   :  { %v523_v63 = vpop.f32.mrf.mxu1  ;;  %1211 = vmatpush.bf16.msrb.mxu1 %v2949_v54 }
 0x1bf   :  { %3045 = vtanh.f32 %v615_v62  ;;  %v2970_v63 = vld [vmem:[%s3771_s3 + $0x28] sm:$0xff] }
 0x1c0   :  { %v462_v0 = vpop.f32.mrf.mxu0 }
 0x1c1   :  { %v2986_v0 = vld [vmem:[%s3769_s2 + $0x28] sm:$0xff] }
 0x1c3   :  { %v3044_v1 = vpop.eup %3043 }
 0x1c4   :  { %v613_v2 = vpop.f32.mrf.mxu2  ;;  %v531_v3 = vpack.c.bf16 %v3044_v1, %v3044_v1 }
 0x1c5   :  { %v3046_v4 = vpop.eup %3045  ;;  %v2978_v2 = vld [vmem:[%s3770_s4 + $0x28] sm:$0xff] }
 0x1c6   :  { %v618_v5 = vpack.c.bf16 %v3046_v4, %v3046_v4  ;;  %2248 = vst [vmem:[%s3775_s6 + $0x4] sm:$0xf] %v531_v3  ;;  %710 = vmatmul.bf16.vlgmr.msrb.gmra.mxu3 %v531_v3  ;;  %v2969_v3 = vld [vmem:[%s3771_s3 + $0x20] sm:$0xff] }
 0x1c7   :  { %1355 = vmatpush.bf16.msrb.mxu3 %v2964_v17  ;;  %v2985_v4 = vld [vmem:[%s3769_s2 + $0x20] sm:$0xff] }
 0x1c8   :  { %771 = vmatmul.bf16.vlgmr.msra.gmra.mxu0 %v618_v5  ;;  %861 = vmatmul.bf16.vlgmr.msra.gmra.mxu1 %v618_v5 }
 0x1c9   :  { %1516 = vmatpush.bf16.msra.mxu1 %v2972_v55  ;;  %1455 = vmatpush.bf16.msra.mxu0 %v2980_v59  ;;  %v3002_v55 = vld [vmem:[%s3770_s4 + $0x28] sm:$0xff]  ;;  %v2991_v59 = vld [vmem:[%s3771_s3 + $0x10] sm:$0xff] }
 0x1cb   :  { %1356 = vmatpush.bf16.msrb.mxu3 %v2963_v19  ;;  %v2967_v19 = vld [vmem:[%s3771_s3 + $0x10] sm:$0xff] }
 0x1cd   :  { %1517 = vmatpush.bf16.msra.mxu1 %v2971_v57  ;;  %1456 = vmatpush.bf16.msra.mxu0 %v2979_v61  ;;  %v3008_v57 = vld [vmem:[%s3769_s2 + $0x18] sm:$0xff] }
 0x1ce   :  { %v3000_v61 = vld [vmem:[%s3770_s4 + $0x18] sm:$0xff] }
 0x1cf   :  { %1357 = vmatpush.bf16.msrb.mxu3 %v2962_v23  ;;  %v2982_v23 = vld [vmem:[%s3769_s2 + $0x8] sm:$0xff] }
 0x1d1   :  { %1518 = vmatpush.bf16.msra.mxu1 %v2970_v63  ;;  %1457 = vmatpush.bf16.msra.mxu0 %v2978_v2  ;;  %v3006_v63 = vld [vmem:[%s3769_s2 + $0x8] sm:$0xff]  ;;  %v3005_v2 = vld [vmem:[%s3769_s2] sm:$0xff] }
 0x1d3   :  { %1358 = vmatpush.bf16.msrb.mxu3 %v2961_v25  ;;  %v2965_v25 = vld [vmem:[%s3771_s3] sm:$0xff] }
 0x1d5   :  { %1519 = vmatpush.bf16.msra.mxu1 %v2969_v3  ;;  %1458 = vmatpush.bf16.msra.mxu0 %v2977_v21  ;;  %v2998_v3 = vld [vmem:[%s3770_s4 + $0x8] sm:$0xff] }
 0x1d7   :  { %1359 = vmatpush.bf16.msrb.mxu3 %v2960_v30  ;;  %v2996_v30 = vld [vmem:[%s3771_s3 + $0x38] sm:$0xff] }
 0x1d9   :  { %1520 = vmatpush.bf16.msra.mxu1 %v2968_v8  ;;  %1459 = vmatpush.bf16.msra.mxu0 %v2976_v24  ;;  %v3027_v8 = vld [vmem:[%s3770_s4 + $0x30] sm:$0xff] }
 0x1db   :  { %1360 = vmatpush.bf16.msrb.mxu3 %v2959_v44  ;;  %v3033_v44 = vld [vmem:[%s3773_s5] ss:$0 sm:$0xff] }
 0x1dd   :  { %1521 = vmatpush.bf16.msra.mxu1 %v2967_v19 }
 0x1df   :  { %1361 = vmatpush.bf16.msrb.mxu3 %v2958_v47 }
 0x1e1   :  { %1522 = vmatpush.bf16.msra.mxu1 %v2966_v22 }
 0x1e3   :  { %1362 = vmatpush.bf16.msrb.mxu3 %v2957_v50 }
 0x1e5   :  { %1523 = vmatpush.bf16.msra.mxu1 %v2965_v25 }
 0x245   :  { %v772_v27 = vpop.f32.mrf.mxu0  ;;  %v862_v28 = vpop.f32.mrf.mxu1 }
 0x246   :  { %v866_v31 = vadd.f32 %v2347_v26, %v862_v28  ;;  %v2981_v26 = vld [vmem:[%s3769_s2] sm:$0xff]  ;;  %v2974_v28 = vld [vmem:[%s3770_s4 + $0x8] sm:$0xff] }
 0x248   :  { %3047 = vtanh.f32 %v866_v31  ;;  %v3012_v31 = vld [vmem:[%s3769_s2 + $0x38] sm:$0xff] }
 0x249   :  { %v711_v33 = vpop.f32.mrf.mxu3 }
 0x24a   :  { %v773_v34 = vadd.f32 %v772_v27, %v711_v33  ;;  %v2975_v27 = vld [vmem:[%s3770_s4 + $0x10] sm:$0xff] }
 0x24b   :  { %1460 = vmatpush.bf16.msra.mxu0 %v2975_v27  ;;  %v2995_v33 = vld [vmem:[%s3771_s3 + $0x30] sm:$0xff] }
 0x24c   :  { %v779_v35 = vadd.f32 %v3031_v32, %v773_v34  ;;  %v3004_v32 = vld [vmem:[%s3770_s4 + $0x38] sm:$0xff]  ;;  %v3011_v34 = vld [vmem:[%s3769_s2 + $0x30] sm:$0xff] }
 0x24d   :  { %v774_v36 = vpop.f32.mrf.mxu0  ;;  %v864_v37 = vpop.f32.mrf.mxu1  ;;  %v3015_v27 = vld [vmem:[%s3771_s3 + $0x10] sm:$0xff] }
 0x24e   :  { %v3048_v38 = vpop.eup %3047  ;;  %3049 = vtanh.f32 %v779_v35  ;;  %v3003_v35 = vld [vmem:[%s3770_s4 + $0x30] sm:$0xff]  ;;  %v2994_v36 = vld [vmem:[%s3771_s3 + $0x28] sm:$0xff] }
 0x24f   :  { %v869_v39 = vpack.c.bf16 %v3048_v38, %v3048_v38  ;;  %1461 = vmatpush.bf16.msra.mxu0 %v2974_v28  ;;  %v3010_v37 = vld [vmem:[%s3769_s2 + $0x28] sm:$0xff] }
 0x250   :  { %v2543_v38 = vld [vmem:[%s3774_s0 + $0x28] sm:$0xff] }
 0x251   :  { %v713_v40 = vpop.f32.mrf.mxu3  ;;  %1022 = vmatmul.bf16.vlgmr.msra.gmra.mxu3 %v869_v39  ;;  %1112 = vmatmul.bf16.vlgmr.msrb.gmra.mxu0 %v869_v39  ;;  %v3026_v28 = vld [vmem:[%s3770_s4 + $0x28] sm:$0xff] }
 0x252   :  { %1706 = vmatpush.bf16.msra.mxu3 %v3004_v32  ;;  %v3024_v32 = vld [vmem:[%s3770_s4 + $0x18] sm:$0xff] }
 0x253   :  { %1462 = vmatpush.bf16.msra.mxu0 %v2973_v29  ;;  %v3014_v29 = vld [vmem:[%s3771_s3 + $0x8] sm:$0xff] }
 0x254   :  { %v3050_v41 = vpop.eup %3049 }
 0x255   :  { %v782_v42 = vpack.c.bf16 %v3050_v41, %v3050_v41  ;;  %v2993_v41 = vld [vmem:[%s3771_s3 + $0x20] sm:$0xff] }
 0x256   :  { %1707 = vmatpush.bf16.msra.mxu3 %v3003_v35  ;;  %v3021_v35 = vld [vmem:[%s3770_s4] sm:$0xff] }
 0x257   :  { %2346 = vst [vmem:[%s3775_s6 + $0x8] sm:$0xf] %v782_v42  ;;  %961 = vmatmul.bf16.vlgmr.msra.gmra.mxu2 %v782_v42  ;;  %1767 = vmatpush.bf16.msrb.mxu0 %v2996_v30  ;;  %v3009_v42 = vld [vmem:[%s3769_s2 + $0x20] sm:$0xff] }
 0x258   :  { %1606 = vmatpush.bf16.msra.mxu2 %v2988_v56  ;;  %v2992_v56 = vld [vmem:[%s3771_s3 + $0x18] sm:$0xff]  ;;  %v3025_v30 = vld [vmem:[%s3770_s4 + $0x20] sm:$0xff] }
 0x25a   :  { %1708 = vmatpush.bf16.msra.mxu3 %v3002_v55 }
 0x25b   :  { %1768 = vmatpush.bf16.msrb.mxu0 %v2995_v33  ;;  %v3023_v33 = vld [vmem:[%s3770_s4 + $0x10] sm:$0xff] }
 0x25c   :  { %1607 = vmatpush.bf16.msra.mxu2 %v2987_v58  ;;  %v3001_v58 = vld [vmem:[%s3770_s4 + $0x20] sm:$0xff] }
 0x25e   :  { %1709 = vmatpush.bf16.msra.mxu3 %v3001_v58 }
 0x25f   :  { %1769 = vmatpush.bf16.msrb.mxu0 %v2994_v36  ;;  %v2739_v36 = vld [vmem:[%s3774_s0 + $0x38] sm:$0xff] }
 0x260   :  { %1608 = vmatpush.bf16.msra.mxu2 %v2986_v0  ;;  %v2999_v0 = vld [vmem:[%s3770_s4 + $0x10] sm:$0xff] }
 0x262   :  { %1710 = vmatpush.bf16.msra.mxu3 %v3000_v61 }
 0x263   :  { %1770 = vmatpush.bf16.msrb.mxu0 %v2993_v41 }
 0x264   :  { %1609 = vmatpush.bf16.msra.mxu2 %v2985_v4  ;;  %v2997_v4 = vld [vmem:[%s3770_s4] sm:$0xff] }
 0x266   :  { %1711 = vmatpush.bf16.msra.mxu3 %v2999_v0 }
 0x267   :  { %1771 = vmatpush.bf16.msrb.mxu0 %v2992_v56 }
 0x268   :  { %1610 = vmatpush.bf16.msra.mxu2 %v2984_v9  ;;  %v3018_v9 = vld [vmem:[%s3771_s3 + $0x28] sm:$0xff] }
 0x26a   :  { %1712 = vmatpush.bf16.msra.mxu3 %v2998_v3 }
 0x26b   :  { %1772 = vmatpush.bf16.msrb.mxu0 %v2991_v59 }
 0x26c   :  { %1611 = vmatpush.bf16.msra.mxu2 %v2983_v20 }
 0x26e   :  { %1713 = vmatpush.bf16.msra.mxu3 %v2997_v4 }
 0x270   :  { %1612 = vmatpush.bf16.msra.mxu2 %v2982_v23 }
 0x274   :  { %1613 = vmatpush.bf16.msra.mxu2 %v2981_v26 }
 0x2ce   :  { %v1113_v62 = vpop.f32.mrf.mxu0 }
 0x2cf   :  { %v1117_v1 = vadd.f32 %v2445_v60, %v1113_v62  ;;  %v3007_v60 = vld [vmem:[%s3769_s2 + $0x10] sm:$0xff]  ;;  %v2990_v62 = vld [vmem:[%s3771_s3 + $0x8] sm:$0xff] }
 0x2d0   :  { %1773 = vmatpush.bf16.msrb.mxu0 %v2990_v62 }
 0x2d1   :  { %3051 = vtanh.f32 %v1117_v1  ;;  %v2989_v1 = vld [vmem:[%s3771_s3] sm:$0xff] }
 0x2d4   :  { %v1023_v5 = vpop.f32.mrf.mxu3  ;;  %1774 = vmatpush.bf16.msrb.mxu0 %v2989_v1 }
 0x2d6   :  { %v1115_v6 = vpop.f32.mrf.mxu0 }
 0x2d7   :  { %v3052_v7 = vpop.eup %3051  ;;  %v3028_v6 = vld [vmem:[%s3770_s4 + $0x38] sm:$0xff] }
 0x2d8   :  { %v1120_v10 = vpack.c.bf16 %v3052_v7, %v3052_v7  ;;  %v3019_v7 = vld [vmem:[%s3771_s3 + $0x30] sm:$0xff] }
 0x2da   :  { %v962_v12 = vpop.f32.mrf.mxu2  ;;  %1273 = vmatmul.bf16.vlgmr.msrb.gmra.mxu2 %v1120_v10  ;;  %1363 = vmatmul.bf16.vlgmr.msrb.gmra.mxu3 %v1120_v10 }
 0x2db   :  { %v1024_v13 = vadd.f32 %v1023_v5, %v962_v12  ;;  %v3020_v5 = vld [vmem:[%s3771_s3 + $0x38] sm:$0xff]  ;;  %1957 = vmatpush.bf16.msrb.mxu2 %v3028_v6  ;;  %v2641_v12 = vld [vmem:[%s3774_s0 + $0x30] sm:$0xff] }
 0x2dc   :  { %v1025_v14 = vpop.f32.mrf.mxu3  ;;  %2018 = vmatpush.bf16.msrb.mxu3 %v3020_v5 }
 0x2dd   :  { %v1030_v15 = vadd.f32 %v3032_v11, %v1024_v13  ;;  %v3017_v11 = vld [vmem:[%s3771_s3 + $0x20] sm:$0xff]  ;;  %v3016_v14 = vld [vmem:[%s3771_s3 + $0x18] sm:$0xff] }
 0x2df   :  { %3053 = vtanh.f32 %v1030_v15  ;;  %1958 = vmatpush.bf16.msrb.mxu2 %v3027_v8 }
 0x2e0   :  { %2019 = vmatpush.bf16.msrb.mxu3 %v3019_v7 }
 0x2e2   :  { %v964_v16 = vpop.f32.mrf.mxu2 }
 0x2e3   :  { %1959 = vmatpush.bf16.msrb.mxu2 %v3026_v28 }
 0x2e4   :  { %2020 = vmatpush.bf16.msrb.mxu3 %v3018_v9 }
 0x2e5   :  { %v3054_v17 = vpop.eup %3053 }
 0x2e6   :  { %v1033_v18 = vpack.c.bf16 %v3054_v17, %v3054_v17  ;;  %v3034_v17 = vld [vmem:[%s3773_s5] ss:$0 sm:$0xff] }
 0x2e7   :  { %1960 = vmatpush.bf16.msrb.mxu2 %v3025_v30 }
 0x2e8   :  { %2444 = vst [vmem:[%s3775_s6 + $0xc] sm:$0xf] %v1033_v18  ;;  %1212 = vmatmul.bf16.vlgmr.msrb.gmra.mxu1 %v1033_v18  ;;  %2021 = vmatpush.bf16.msrb.mxu3 %v3017_v11 }
 0x2e9   :  { %1857 = vmatpush.bf16.msrb.mxu1 %v3012_v31  ;;  %v3013_v31 = vld [vmem:[%s3771_s3] sm:$0xff] }
 0x2eb   :  { %1961 = vmatpush.bf16.msrb.mxu2 %v3024_v32 }
 0x2ec   :  { %2022 = vmatpush.bf16.msrb.mxu3 %v3016_v14 }
 0x2ed   :  { %1858 = vmatpush.bf16.msrb.mxu1 %v3011_v34  ;;  %v3022_v34 = vld [vmem:[%s3770_s4 + $0x8] sm:$0xff] }
 0x2ef   :  { %1962 = vmatpush.bf16.msrb.mxu2 %v3023_v33 }
 0x2f0   :  { %2023 = vmatpush.bf16.msrb.mxu3 %v3015_v27 }
 0x2f1   :  { %1859 = vmatpush.bf16.msrb.mxu1 %v3010_v37 }
 0x2f3   :  { %1963 = vmatpush.bf16.msrb.mxu2 %v3022_v34 }
 0x2f4   :  { %2024 = vmatpush.bf16.msrb.mxu3 %v3014_v29 }
 0x2f5   :  { %1860 = vmatpush.bf16.msrb.mxu1 %v3009_v42 }
 0x2f7   :  { %1964 = vmatpush.bf16.msrb.mxu2 %v3021_v35 }
 0x2f8   :  { %2025 = vmatpush.bf16.msrb.mxu3 %v3013_v31 }
 0x2f9   :  { %1861 = vmatpush.bf16.msrb.mxu1 %v3008_v57 }
 0x2fd   :  { %1862 = vmatpush.bf16.msrb.mxu1 %v3007_v60 }
 0x301   :  { %1863 = vmatpush.bf16.msrb.mxu1 %v3006_v63 }
 0x305   :  { %1864 = vmatpush.bf16.msrb.mxu1 %v3005_v2 }
 0x35d   :  { %v1274_v39 = vpop.f32.mrf.mxu2  ;;  %v1364_v40 = vpop.f32.mrf.mxu3 }
 0x35e   :  { %v1368_v43 = vadd.f32 %v2543_v38, %v1364_v40 }
 0x360   :  { %3055 = vtanh.f32 %v1368_v43 }
 0x365   :  { %v1213_v45 = vpop.f32.mrf.mxu1  ;;  %v1276_v46 = vpop.f32.mrf.mxu2 }
 0x366   :  { %v3056_v47 = vpop.eup %3055  ;;  %v1275_v48 = vadd.f32 %v1274_v39, %v1213_v45  ;;  %v1366_v49 = vpop.f32.mrf.mxu3 }
 0x367   :  { %v1371_v50 = vpack.c.bf16 %v3056_v47, %v3056_v47 }
 0x368   :  { %v1281_v51 = vadd.f32 %v3033_v44, %v1275_v48  ;;  %v3035_v44 = vld [vmem:[%s3773_s5] ss:$0 sm:$0xff] }
 0x369   :  { %1524 = vmatmul.bf16.vlgmr.msra.gmra.mxu1 %v1371_v50  ;;  %1614 = vmatmul.bf16.vlgmr.msra.gmra.mxu2 %v1371_v50 }
 0x36a   :  { %3057 = vtanh.f32 %v1281_v51 }
 0x36d   :  { %v1215_v52 = vpop.f32.mrf.mxu1 }
 0x370   :  { %v3058_v53 = vpop.eup %3057 }
 0x371   :  { %v1284_v54 = vpack.c.bf16 %v3058_v53, %v3058_v53  ;;  %v3036_v53 = vld [vmem:[%s3773_s5] ss:$0 sm:$0xff] }
 0x373   :  { %2542 = vst [vmem:[%s3775_s6 + $0x10] sm:$0xf] %v1284_v54  ;;  %1463 = vmatmul.bf16.vlgmr.msra.gmra.mxu0 %v1284_v54 }
 0x3e6   :  { %v1525_v10 = vpop.f32.mrf.mxu1 }
 0x3ec   :  { %v1615_v13 = vpop.f32.mrf.mxu2 }
 0x3ed   :  { %v1619_v15 = vadd.f32 %v2641_v12, %v1615_v13 }
 0x3ee   :  { %v1527_v16 = vpop.f32.mrf.mxu1 }
 0x3ef   :  { %3059 = vtanh.f32 %v1619_v15 }
 0x3f0   :  { %v1464_v18 = vpop.f32.mrf.mxu0 }
 0x3f1   :  { %v1526_v19 = vadd.f32 %v1525_v10, %v1464_v18 }
 0x3f3   :  { %v1532_v20 = vadd.f32 %v3034_v17, %v1526_v19 }
 0x3f4   :  { %v1617_v21 = vpop.f32.mrf.mxu2 }
 0x3f5   :  { %v3060_v22 = vpop.eup %3059  ;;  %3061 = vtanh.f32 %v1532_v20 }
 0x3f6   :  { %v1622_v23 = vpack.c.bf16 %v3060_v22, %v3060_v22 }
 0x3f8   :  { %v1466_v24 = vpop.f32.mrf.mxu0  ;;  %1775 = vmatmul.bf16.vlgmr.msrb.gmra.mxu0 %v1622_v23  ;;  %1865 = vmatmul.bf16.vlgmr.msrb.gmra.mxu1 %v1622_v23 }
 0x3fb   :  { %v3062_v25 = vpop.eup %3061 }
 0x3fc   :  { %v1535_v26 = vpack.c.bf16 %v3062_v25, %v3062_v25 }
 0x3fe   :  { %2640 = vst [vmem:[%s3775_s6 + $0x14] sm:$0xf] %v1535_v26  ;;  %1714 = vmatmul.bf16.vlgmr.msra.gmra.mxu3 %v1535_v26 }
 0x475   :  { %v1776_v37 = vpop.f32.mrf.mxu0  ;;  %v1866_v38 = vpop.f32.mrf.mxu1 }
 0x476   :  { %v1870_v39 = vadd.f32 %v2739_v36, %v1866_v38 }
 0x478   :  { %3063 = vtanh.f32 %v1870_v39 }
 0x47d   :  { %v1778_v40 = vpop.f32.mrf.mxu0  ;;  %v1868_v41 = vpop.f32.mrf.mxu1 }
 0x47e   :  { %v3064_v42 = vpop.eup %3063 }
 0x47f   :  { %2045 = vst [vmem:[%s3776_s7] sm:$0xff] %v3064_v42  ;;  %v1873_v43 = vpack.c.bf16 %v3064_v42, %v3064_v42 }
 0x481   :  { %v1715_v45 = vpop.f32.mrf.mxu3  ;;  %2026 = vmatmul.bf16.vlgmr.msrb.gmra.mxu3 %v1873_v43 }
 0x482   :  { %v1777_v46 = vadd.f32 %v1776_v37, %v1715_v45 }
 0x484   :  { %v1783_v47 = vadd.f32 %v3035_v44, %v1777_v46 }
 0x486   :  { %3065 = vtanh.f32 %v1783_v47 }
 0x489   :  { %v1717_v48 = vpop.f32.mrf.mxu3 }
 0x48c   :  { %v3066_v49 = vpop.eup %3065 }
 0x48d   :  { %v1786_v50 = vpack.c.bf16 %v3066_v49, %v3066_v49 }
 0x48f   :  { %2738 = vst [vmem:[%s3775_s6 + $0x18] sm:$0xf] %v1786_v50  ;;  %1965 = vmatmul.bf16.vlgmr.msrb.gmra.mxu2 %v1786_v50 }
 0x504   :  { %v2027_v51 = vpop.f32.mrf.mxu3 }
 0x50c   :  { %v2029_v52 = vpop.f32.mrf.mxu3 }
 0x512   :  { %v1966_v54 = vpop.f32.mrf.mxu2 }
 0x513   :  { %v2028_v55 = vadd.f32 %v2027_v51, %v1966_v54 }
 0x515   :  { %v2034_v56 = vadd.f32 %v3036_v53, %v2028_v55 }
 0x517   :  { %3067 = vtanh.f32 %v2034_v56 }
 0x51a   :  { %v1968_v57 = vpop.f32.mrf.mxu2 }
 0x51d   :  { %v3068_v58 = vpop.eup %3067 }
 0x51e   :  { %v2037_v59 = vpack.c.bf16 %v3068_v58, %v3068_v58  ;;  %2046 = vst [vmem:[%s3776_s7 + $0x8] sm:$0xff] %v3068_v58 }
 0x520   :  { %2836 = vst [vmem:[%s3775_s6 + $0x1c] sm:$0xf] %v2037_v59 }

</bundles_post_ra>
